<compile_context>
chip_gen: v7x
topology: tpu7x:2x2x1
jax: 0.10.0
libtpu: 0.0.40
codegen_flags: <defaults>
</compile_context>

<pallas_src>
import jax
import jax.numpy as jnp
from jax.experimental import pallas as pl
from jax.experimental.pallas import tpu as pltpu

INPUT_DIM = 710
H1, H2, H3, OUT = 512, 512, 32, 1


def _round_up(x, m):
    return ((x + m - 1) // m) * m


def _mil_kernel(x_ref, w1_ref, b1_ref, w2_ref, b2_ref, w3_ref, b3_ref,
                w4_ref, b4_ref, o_ref, xs_ref):
    tm, d_in = x_ref.shape          # (row tile, 710)
    d_pad = xs_ref.shape[1]         # 768 (lane-aligned)

    # Stage the input tile into a lane-aligned bf16 scratch.  Only the last 128-lane
    # column can contain padding: zero it first (aligned store), then overwrite the
    # logical lanes with data, so the layer-1 matmul sees real zeros in the padding.
    k0 = (d_in // 128) * 128
    if d_pad > d_in:
        xs_ref[:, k0:d_pad] = jnp.zeros((tm, d_pad - k0), jnp.bfloat16)
    xs_ref[:, :d_in] = x_ref[...].astype(jnp.bfloat16)

    # Layer 1: (tm, 768) @ (768, 512), bf16 MXU inputs, f32 accumulation.
    h = jnp.dot(xs_ref[...], w1_ref[...], preferred_element_type=jnp.float32)
    h = jnp.maximum(h + b1_ref[...], 0.0)
    # Layer 2: (tm, 512) @ (512, 512)
    h = jnp.dot(h.astype(jnp.bfloat16), w2_ref[...],
                preferred_element_type=jnp.float32)
    h = jnp.maximum(h + b2_ref[...], 0.0)
    # Layer 3: (tm, 512) @ (512, 32)
    h = jnp.dot(h.astype(jnp.bfloat16), w3_ref[...],
                preferred_element_type=jnp.float32)
    h = jnp.maximum(h + b3_ref[...], 0.0)
    # Layer 4: (tm, 32) . (32,) -> VPU multiply + lane reduction, then sigmoid in f32.
    z = jnp.sum(h * w4_ref[...], axis=-1, keepdims=True) + b4_ref[...]
    # Output kept as a (tm, 1) column block (matches module output layout); the masked
    # narrow store is negligible next to the matmuls.
    o_ref[...] = jax.nn.sigmoid(z)


def init_params(key, input_dim=INPUT_DIM, dtype=jnp.float32):
    """Xavier-normal weights, stored as (in_features, out_features); uniform biases."""
    dims = [(input_dim, H1), (H1, H2), (H2, H3), (H3, OUT)]
    params = []
    for fan_in, fan_out in dims:
        key, wk, bk = jax.random.split(key, 3)
        std = (2.0 / (fan_in + fan_out)) ** 0.5
        w = jax.random.normal(wk, (fan_in, fan_out), dtype) * std
        bound = 1.0 / (fan_in ** 0.5)
        b = jax.random.uniform(bk, (1, fan_out), dtype, -bound, bound)
        params.append((w, b))
    return params


def prepare_params(params):
    """One-time (outside the jitted forward) cast/pad into the kernel layout."""
    (w1, b1), (w2, b2), (w3, b3), (w4, b4) = params
    input_dim = w1.shape[0]
    d_pad = _round_up(input_dim, 128)
    w1p = jnp.pad(w1.astype(jnp.bfloat16), ((0, d_pad - input_dim), (0, 0)))
    return (w1p, b1.astype(jnp.float32),
            w2.astype(jnp.bfloat16), b2.astype(jnp.float32),
            w3.astype(jnp.bfloat16), b3.astype(jnp.float32),
            w4.astype(jnp.float32).reshape(1, H3),   # (1, 32) row for the VPU reduce
            b4.astype(jnp.float32).reshape(1, OUT))  # (1, 1)


@jax.jit
def mil_classifier_forward(x, w1p, b1, w2, b2, w3, b3, w4r, b4):
    """x: (..., input_dim) -> (N, 1) float32, N = prod(leading dims)."""
    input_dim = x.shape[-1]
    d_pad = w1p.shape[0]
    x2 = x.reshape(-1, input_dim).astype(jnp.float32)
    n = x2.shape[0]

    # Row tiling: one full-array block for small N; tm=512 otherwise.  No activation
    # padding: a non-dividing tail tile is handled by the masked boundary block.
    if n <= 512:
        tm = n
        num_tiles = 1
    else:
        tm = 512
        num_tiles = pl.cdiv(n, tm)

    # Keep tiny grids on a single TensorCore; large grids are embarrassingly parallel
    # over row tiles (megacore on v7x).
    semantics = ("arbitrary",) if num_tiles <= 2 else ("parallel",)

    full = lambda *shape: pl.BlockSpec(shape, lambda i: (0,) * len(shape))

    weight_bytes = (w1p.size * 2 + w2.size * 2 + w3.size * 2 +
                    (b1.size + b2.size + b3.size + w4r.size + b4.size) * 4)
    cost = pl.CostEstimate(
        flops=2 * n * (d_pad * H1 + H1 * H2 + H2 * H3 + H3 * OUT),
        transcendentals=n,
        bytes_accessed=n * input_dim * 4 + weight_bytes + n * OUT * 4)

    out = pl.pallas_call(
        _mil_kernel,
        out_shape=jax.ShapeDtypeStruct((n, OUT), jnp.float32),
        grid_spec=pltpu.PrefetchScalarGridSpec(
            num_scalar_prefetch=0,
            grid=(num_tiles,),
            in_specs=[
                pl.BlockSpec((tm, input_dim), lambda i: (i, 0)),  # x row tile (full feature dim)
                full(d_pad, H1), full(1, H1),                     # W1 (pre-padded, bf16), b1
                full(H1, H2),   full(1, H2),                      # W2 (bf16), b2
                full(H2, H3),   full(1, H3),                      # W3 (bf16), b3
                full(1, H3),    full(1, OUT),                     # w4 row, b4
            ],
            out_specs=pl.BlockSpec((tm, OUT), lambda i: (i, 0)),
            scratch_shapes=[pltpu.VMEM((tm, d_pad), jnp.bfloat16)],
        ),
        compiler_params=pltpu.CompilerParams(
            dimension_semantics=semantics,
            vmem_limit_bytes=32 * 1024 * 1024,
        ),
        cost_estimate=cost,
    )(x2, w1p, b1, w2, b2, w3, b3, w4r, b4)

    return out


def _reference_f32(x, params):
    h = x.reshape(-1, x.shape[-1]).astype(jnp.float32)
    (w1, b1), (w2, b2), (w3, b3), (w4, b4) = params
    h = jnp.maximum(h @ w1 + b1, 0.0)
    h = jnp.maximum(h @ w2 + b2, 0.0)
    h = jnp.maximum(h @ w3 + b3, 0.0)
    return jax.nn.sigmoid(h @ w4 + b4)


def _reference_matched(x, w1p, b1, w2, b2, w3, b3, w4r, b4):
    """Same math as the kernel (bf16 matmul inputs, f32 accumulation) in plain jnp."""
    h = x.reshape(-1, x.shape[-1]).astype(jnp.float32)
    pad = w1p.shape[0] - h.shape[-1]
    hb = jnp.pad(h.astype(jnp.bfloat16), ((0, 0), (0, pad)))
    h = jnp.maximum(jnp.dot(hb, w1p, preferred_element_type=jnp.float32) + b1, 0.0)
    h = jnp.maximum(jnp.dot(h.astype(jnp.bfloat16), w2,
                            preferred_element_type=jnp.float32) + b2, 0.0)
    h = jnp.maximum(jnp.dot(h.astype(jnp.bfloat16), w3,
                            preferred_element_type=jnp.float32) + b3, 0.0)
    z = jnp.sum(h * w4r, axis=-1, keepdims=True) + b4
    return jax.nn.sigmoid(z)


if __name__ == "__main__":
    key = jax.random.PRNGKey(0)
    pkey, xkey = jax.random.split(key)

    params = init_params(pkey, INPUT_DIM)
    kparams = prepare_params(params)   # one-time cast/pad, outside the jitted forward

    # MIL-style input: (batch=2, segments=8, feature=710) -> flattened to (16, 710)
    x = jax.random.normal(xkey, (2, 8, INPUT_DIM), jnp.float32)

    y = mil_classifier_forward(x, *kparams)
    y = jax.block_until_ready(y)

    assert y.shape == (16, 1), y.shape
    y_match = _reference_matched(x, *kparams)     # same bf16/f32 math as the kernel
    y_f32 = _reference_f32(x, params)             # full f32 reference (module semantics)
    assert jnp.allclose(y, y_match, atol=5e-3), float(jnp.max(jnp.abs(y - y_match)))
    assert jnp.allclose(y, y_f32, atol=5e-2), float(jnp.max(jnp.abs(y - y_f32)))

    print("KERNEL_OK")
</pallas_src>

<mosaic_0001>
module attributes {stable_mosaic.version = 11 : i64} {
  func.func @_mil_kernel(%arg0: i32, %arg1: memref<16x710xf32, #tpu.memory_space<vmem>>, %arg2: memref<768x512xbf16, #tpu.memory_space<vmem>>, %arg3: memref<1x512xf32, #tpu.memory_space<vmem>>, %arg4: memref<512x512xbf16, #tpu.memory_space<vmem>>, %arg5: memref<1x512xf32, #tpu.memory_space<vmem>>, %arg6: memref<512x32xbf16, #tpu.memory_space<vmem>>, %arg7: memref<1x32xf32, #tpu.memory_space<vmem>>, %arg8: memref<1x32xf32, #tpu.memory_space<vmem>>, %arg9: memref<1x1xf32, #tpu.memory_space<vmem>>, %arg10: memref<16x1xf32, #tpu.memory_space<vmem>>, %arg11: memref<16x768xbf16, #tpu.memory_space<vmem>>) attributes {dimension_semantics = [#tpu.dimension_semantics<arbitrary>], iteration_bounds = array<i64: 1>, scalar_prefetch = 0 : i64, scratch_operands = 1 : i64, tpu.core_type = #tpu.core_type<tc>, window_params = [{transform_indices = @transform_0, window_bounds = array<i64: 16, 710>}, {pipeline_mode = #tpu.pipeline_mode<synchronous>, transform_indices = @transform_1, window_bounds = array<i64: 768, 512>}, {pipeline_mode = #tpu.pipeline_mode<synchronous>, transform_indices = @transform_2, window_bounds = array<i64: 1, 512>}, {pipeline_mode = #tpu.pipeline_mode<synchronous>, transform_indices = @transform_3, window_bounds = array<i64: 512, 512>}, {pipeline_mode = #tpu.pipeline_mode<synchronous>, transform_indices = @transform_4, window_bounds = array<i64: 1, 512>}, {pipeline_mode = #tpu.pipeline_mode<synchronous>, transform_indices = @transform_5, window_bounds = array<i64: 512, 32>}, {pipeline_mode = #tpu.pipeline_mode<synchronous>, transform_indices = @transform_6, window_bounds = array<i64: 1, 32>}, {pipeline_mode = #tpu.pipeline_mode<synchronous>, transform_indices = @transform_7, window_bounds = array<i64: 1, 32>}, {pipeline_mode = #tpu.pipeline_mode<synchronous>, transform_indices = @transform_8, window_bounds = array<i64: 1, 1>}, {transform_indices = @transform_9, window_bounds = array<i64: 16, 1>}]} {
    %cst = arith.constant 0.000000e+00 : bf16
    %0 = vector.broadcast %cst : bf16 to vector<16x128xbf16>
    %c0 = arith.constant 0 : index
    %c640 = arith.constant 640 : index
    %1 = vector.load %arg11[%c0, %c640] : memref<16x768xbf16, #tpu.memory_space<vmem>>, vector<16x128xbf16>
    tpu.vector_store %arg11[%c0, %c640], %0 {strides = array<i32>} : memref<16x768xbf16, #tpu.memory_space<vmem>>, vector<16x128xbf16>,
    %c0_0 = arith.constant 0 : index
    %c0_1 = arith.constant 0 : index
    %2 = vector.load %arg1[%c0_0, %c0_1] : memref<16x710xf32, #tpu.memory_space<vmem>>, vector<16x710xf32>
    %3 = arith.truncf %2 : vector<16x710xf32> to vector<16x710xbf16>
    %c0_2 = arith.constant 0 : index
    %c0_3 = arith.constant 0 : index
    %4 = vector.load %arg11[%c0_2, %c0_3] : memref<16x768xbf16, #tpu.memory_space<vmem>>, vector<16x710xbf16>
    tpu.vector_store %arg11[%c0_2, %c0_3], %3 {strides = array<i32>} : memref<16x768xbf16, #tpu.memory_space<vmem>>, vector<16x710xbf16>,
    %c0_4 = arith.constant 0 : index
    %c0_5 = arith.constant 0 : index
    %5 = vector.load %arg11[%c0_4, %c0_5] : memref<16x768xbf16, #tpu.memory_space<vmem>>, vector<16x768xbf16>
    %c0_6 = arith.constant 0 : index
    %c0_7 = arith.constant 0 : index
    %6 = vector.load %arg2[%c0_6, %c0_7] : memref<768x512xbf16, #tpu.memory_space<vmem>>, vector<768x512xbf16>
    %cst_8 = arith.constant dense<0.000000e+00> : vector<16x512xf32>
    %7 = tpu.matmul %5, %6, %cst_8 {dimension_numbers = #tpu.dot_dimension_numbers<[1], [0], [0], [1], [0, 0, 1, 1], [], []>} : vector<16x768xbf16>, vector<768x512xbf16>, vector<16x512xf32> -> vector<16x512xf32>
    %c0_9 = arith.constant 0 : index
    %c0_10 = arith.constant 0 : index
    %8 = vector.load %arg3[%c0_9, %c0_10] : memref<1x512xf32, #tpu.memory_space<vmem>>, vector<1x512xf32>
    %9 = vector.broadcast %8 : vector<1x512xf32> to vector<16x512xf32>
    %10 = arith.addf %7, %9 : vector<16x512xf32>
    %cst_11 = arith.constant 0.000000e+00 : f32
    %11 = vector.broadcast %cst_11 : f32 to vector<16x512xf32>
    %12 = arith.maximumf %10, %11 : vector<16x512xf32>
    %13 = arith.truncf %12 : vector<16x512xf32> to vector<16x512xbf16>
    %c0_12 = arith.constant 0 : index
    %c0_13 = arith.constant 0 : index
    %14 = vector.load %arg4[%c0_12, %c0_13] : memref<512x512xbf16, #tpu.memory_space<vmem>>, vector<512x512xbf16>
    %cst_14 = arith.constant dense<0.000000e+00> : vector<16x512xf32>
    %15 = tpu.matmul %13, %14, %cst_14 {dimension_numbers = #tpu.dot_dimension_numbers<[1], [0], [0], [1], [0, 0, 1, 1], [], []>} : vector<16x512xbf16>, vector<512x512xbf16>, vector<16x512xf32> -> vector<16x512xf32>
    %c0_15 = arith.constant 0 : index
    %c0_16 = arith.constant 0 : index
    %16 = vector.load %arg5[%c0_15, %c0_16] : memref<1x512xf32, #tpu.memory_space<vmem>>, vector<1x512xf32>
    %17 = vector.broadcast %16 : vector<1x512xf32> to vector<16x512xf32>
    %18 = arith.addf %15, %17 : vector<16x512xf32>
    %cst_17 = arith.constant 0.000000e+00 : f32
    %19 = vector.broadcast %cst_17 : f32 to vector<16x512xf32>
    %20 = arith.maximumf %18, %19 : vector<16x512xf32>
    %21 = arith.truncf %20 : vector<16x512xf32> to vector<16x512xbf16>
    %c0_18 = arith.constant 0 : index
    %c0_19 = arith.constant 0 : index
    %22 = vector.load %arg6[%c0_18, %c0_19] : memref<512x32xbf16, #tpu.memory_space<vmem>>, vector<512x32xbf16>
    %cst_20 = arith.constant dense<0.000000e+00> : vector<16x32xf32>
    %23 = tpu.matmul %21, %22, %cst_20 {dimension_numbers = #tpu.dot_dimension_numbers<[1], [0], [0], [1], [0, 0, 1, 1], [], []>} : vector<16x512xbf16>, vector<512x32xbf16>, vector<16x32xf32> -> vector<16x32xf32>
    %c0_21 = arith.constant 0 : index
    %c0_22 = arith.constant 0 : index
    %24 = vector.load %arg7[%c0_21, %c0_22] : memref<1x32xf32, #tpu.memory_space<vmem>>, vector<1x32xf32>
    %25 = vector.broadcast %24 : vector<1x32xf32> to vector<16x32xf32>
    %26 = arith.addf %23, %25 : vector<16x32xf32>
    %cst_23 = arith.constant 0.000000e+00 : f32
    %27 = vector.broadcast %cst_23 : f32 to vector<16x32xf32>
    %28 = arith.maximumf %26, %27 : vector<16x32xf32>
    %c0_24 = arith.constant 0 : index
    %c0_25 = arith.constant 0 : index
    %29 = vector.load %arg8[%c0_24, %c0_25] : memref<1x32xf32, #tpu.memory_space<vmem>>, vector<1x32xf32>
    %30 = vector.broadcast %29 : vector<1x32xf32> to vector<16x32xf32>
    %31 = arith.mulf %28, %30 : vector<16x32xf32>
    %cst_26 = arith.constant dense<0.000000e+00> : vector<16xf32>
    %32 = vector.multi_reduction <add>, %31, %cst_26 [1] : vector<16x32xf32> to vector<16xf32>
    %33 = vector.shape_cast %32 : vector<16xf32> to vector<16x1xf32>
    %c0_27 = arith.constant 0 : index
    %c0_28 = arith.constant 0 : index
    %34 = vector.load %arg9[%c0_27, %c0_28] : memref<1x1xf32, #tpu.memory_space<vmem>>, vector<1x1xf32>
    %35 = vector.broadcast %34 : vector<1x1xf32> to vector<16x1xf32>
    %36 = arith.addf %33, %35 : vector<16x1xf32>
    %37 = arith.negf %36 : vector<16x1xf32>
    %38 = math.exp %37 : vector<16x1xf32>
    %cst_29 = arith.constant 1.000000e+00 : f32
    %39 = vector.broadcast %cst_29 : f32 to vector<16x1xf32>
    %40 = arith.addf %39, %38 : vector<16x1xf32>
    %41 = arith.divf %39, %40 : vector<16x1xf32>
    %c0_30 = arith.constant 0 : index
    %c0_31 = arith.constant 0 : index
    %42 = vector.load %arg10[%c0_30, %c0_31] : memref<16x1xf32, #tpu.memory_space<vmem>>, vector<16x1xf32>
    tpu.vector_store %arg10[%c0_30, %c0_31], %41 {strides = array<i32>} : memref<16x1xf32, #tpu.memory_space<vmem>>, vector<16x1xf32>,
    return
  }
  func.func @transform_0(%arg0: i32) -> (i32, i32) {
    %c0_i32 = arith.constant 0 : i32
    %c0_i32_0 = arith.constant 0 : i32
    return %arg0, %c0_i32 : i32, i32
  }
  func.func @transform_1(%arg0: i32) -> (i32, i32) {
    %c0_i32 = arith.constant 0 : i32
    %c0_i32_0 = arith.constant 0 : i32
    %c0_i32_1 = arith.constant 0 : i32
    return %c0_i32, %c0_i32_0 : i32, i32
  }
  func.func @transform_2(%arg0: i32) -> (i32, i32) {
    %c0_i32 = arith.constant 0 : i32
    %c0_i32_0 = arith.constant 0 : i32
    %c0_i32_1 = arith.constant 0 : i32
    return %c0_i32, %c0_i32_0 : i32, i32
  }
  func.func @transform_3(%arg0: i32) -> (i32, i32) {
    %c0_i32 = arith.constant 0 : i32
    %c0_i32_0 = arith.constant 0 : i32
    %c0_i32_1 = arith.constant 0 : i32
    return %c0_i32, %c0_i32_0 : i32, i32
  }
  func.func @transform_4(%arg0: i32) -> (i32, i32) {
    %c0_i32 = arith.constant 0 : i32
    %c0_i32_0 = arith.constant 0 : i32
    %c0_i32_1 = arith.constant 0 : i32
    return %c0_i32, %c0_i32_0 : i32, i32
  }
  func.func @transform_5(%arg0: i32) -> (i32, i32) {
    %c0_i32 = arith.constant 0 : i32
    %c0_i32_0 = arith.constant 0 : i32
    %c0_i32_1 = arith.constant 0 : i32
    return %c0_i32, %c0_i32_0 : i32, i32
  }
  func.func @transform_6(%arg0: i32) -> (i32, i32) {
    %c0_i32 = arith.constant 0 : i32
    %c0_i32_0 = arith.constant 0 : i32
    %c0_i32_1 = arith.constant 0 : i32
    return %c0_i32, %c0_i32_0 : i32, i32
  }
  func.func @transform_7(%arg0: i32) -> (i32, i32) {
    %c0_i32 = arith.constant 0 : i32
    %c0_i32_0 = arith.constant 0 : i32
    %c0_i32_1 = arith.constant 0 : i32
    return %c0_i32, %c0_i32_0 : i32, i32
  }
  func.func @transform_8(%arg0: i32) -> (i32, i32) {
    %c0_i32 = arith.constant 0 : i32
    %c0_i32_0 = arith.constant 0 : i32
    %c0_i32_1 = arith.constant 0 : i32
    return %c0_i32, %c0_i32_0 : i32, i32
  }
  func.func @transform_9(%arg0: i32) -> (i32, i32) {
    %c0_i32 = arith.constant 0 : i32
    %c0_i32_0 = arith.constant 0 : i32
    return %arg0, %c0_i32 : i32, i32
  }
}

</mosaic_0001>

<bundles_post_ra>
// kernel: mil_classifier_forward.1
= control target key start
LH: loop header
LB: loop body
LE: loop exit
PB: predicated region body
PF: predicated region fallthrough
CT: control target
= control target key end

     0   :  { %s4186_s0 = inlined_call_operand.vmem [shape: f32[16,710], index: 0, kind: input, shape index: {}]   ;;  %s4187_s1 = inlined_call_operand.hbm [shape: bf16[768,512], index: 1, kind: input, shape index: {}]   ;;  %s4188_s2 = inlined_call_operand.vmem [shape: f32[1,512], index: 2, kind: input, shape index: {}]   ;;  %s4189_s3 = inlined_call_operand.hbm [shape: bf16[512,512], index: 3, kind: input, shape index: {}]   ;;  %s4190_s4 = inlined_call_operand.vmem [shape: f32[1,512], index: 4, kind: input, shape index: {}]   ;;  %s4191_s5 = inlined_call_operand.vmem [shape: bf16[512,32], index: 5, kind: input, shape index: {}]   ;;  %s4192_s6 = inlined_call_operand.vmem [shape: f32[1,32], index: 6, kind: input, shape index: {}]   ;;  %s4193_s7 = inlined_call_operand.vmem [shape: f32[1,32], index: 7, kind: input, shape index: {}]   ;;  %s4194_s8 = inlined_call_operand.<no memory space> [shape: f32[1,1], index: 8, kind: input, shape index: {}]   ;;  %s4195_s9 = inlined_call_operand.vmem [shape: f32[16,1], index: 9, kind: output, shape index: {}]  }
   0x1   :  { %v14_v0 = vstv %s4194_s8 }
   0x2   :  { %15 = vst [vmem:[#allocation3] sm:$0x1] %v14_v0 }
   0x3   :  { %16 = vsyncpa [#allocation5], 0 }
   0x4   :  { %17 = vsyncpa [#allocation7], 0  ;;  %s3920_s11 = smov [#allocation4]   ;;  %s3872_s15 = scalar_lea.hbm %s4187_s1, 24576 }
   0x5   :  { %s25_s12 = sshll.u32 %s3920_s11, 4  ;;  %p3873_p0 = scmp.ne.s32.totalorder %s4187_s1, %s3872_s15  ;;  %s26_s12 = int_to_ptr.vmem [resolvable:$true] %s25_s12 }
   0x6   :  { %p3876_p1 = scmp.lt.u32.totalorder %s3872_s15, %s4187_s1 }
   0x8   :  { %p3878_p2 = pnand %p3876_p1, %p3873_p0 }
   0xa   :  { %3881 = shalt.err (!%p3878_p2)
}
   0xb   :  { %s3882_s8 = scalar_lea.vmem %s26_s12, 24576  ;;  %p3887_p4 = scmp.lt.s32.totalorder %s26_s12, %s26_s12 }
   0xc   :  { %p3883_p3 = scmp.ne.s32.totalorder %s26_s12, %s3882_s8  ;;  %p3888_p5 = scmp.lt.s32.totalorder %s3882_s8, %s3882_s8 }
   0xe   :  { %p3889_p6 = por %p3888_p5, %p3887_p4 }
  0x10   :  { %p3890_p7 = pnand %p3889_p6, %p3883_p3 }
  0x12   :  { %3893 = shalt.err (!%p3890_p7)
}
  0x13   :  { %s3921_s20 = smov 256   ;;  %s3922_s21 = smov 16  }
  0x14   :  { %31 = dma.hbm_to_vmem [thread:$0]  %s4187_s1, 24576, %s26_s12, [#allocation5], %s3921_s20, %s3921_s20, %s3922_s21  }
  0x15   :  { %s3923_s24 = smov [#allocation6]   ;;  %s3894_s28 = scalar_lea.hbm %s4189_s3, 16384 }
  0x16   :  { %s39_s25 = sshll.u32 %s3923_s24, 4  ;;  %p3895_p8 = scmp.ne.s32.totalorder %s4189_s3, %s3894_s28  ;;  %s40_s25 = int_to_ptr.vmem [resolvable:$true] %s39_s25 }
  0x17   :  { %p3898_p9 = scmp.lt.u32.totalorder %s3894_s28, %s4189_s3 }
  0x19   :  { %p3900_p10 = pnand %p3898_p9, %p3895_p8 }
  0x1b   :  { %3903 = shalt.err (!%p3900_p10)
}
  0x1c   :  { %s3904_s13 = scalar_lea.vmem %s40_s25, 16384  ;;  %p3909_p12 = scmp.lt.s32.totalorder %s40_s25, %s40_s25 }
  0x1d   :  { %p3905_p11 = scmp.ne.s32.totalorder %s40_s25, %s3904_s13  ;;  %p3910_p13 = scmp.lt.s32.totalorder %s3904_s13, %s3904_s13 }
  0x1f   :  { %p3911_p0 = por %p3910_p13, %p3909_p12 }
  0x21   :  { %p3912_p1 = pnand %p3911_p0, %p3905_p11 }
  0x23   :  { %3915 = shalt.err (!%p3912_p1)
}
  0x24   :  { %45 = dma.hbm_to_vmem [thread:$0]  %s4189_s3, 16384, %s40_s25, [#allocation7], %s3921_s20, %s3921_s20, %s3922_s21  }
  0x25   :  { %3916 = dma.done.wait [#allocation5], 24576  }
  0x26   :  { %3917 = vsyncadd [#allocation5], 4294942720 }
  0x27   :  { %3918 = dma.done.wait [#allocation7], 16384  }
  0x28   :  { %3919 = vsyncadd [#allocation7], 4294950912  ;;  %v3352_v1 = vld [vmem:[#allocation4 + $0x4] ss:$16 sps:$4 sm:$0xff]   ;;  %v3354_v2 = vld [vmem:[#allocation4 + $0xc] ss:$16 sps:$4 sm:$0xff]  }
  0x29   :  { %1269 = vmatprep.subr.bf16.mxu0 %v3352_v1  ;;  %v3356_v3 = vld [vmem:[#allocation4] ss:$16 sps:$4 sm:$0xff]   ;;  %v3357_v4 = vld [vmem:[#allocation4 + $0x8] ss:$16 sps:$4 sm:$0xff]   ;;  %1398 = vmatprep.subr.bf16.mxu1 %v3354_v2  ;;  %v3358_v5 = vld [vmem:[#allocation4 + $0x24] ss:$16 sps:$4 sm:$0xff]  }
  0x2a   :  { %1270 = vmatpush1.bf16.msra.mxu0 %v3356_v3  ;;  %1399 = vmatpush1.bf16.msra.mxu1 %v3357_v4  ;;  %v3360_v6 = vld [vmem:[#allocation4 + $0x2c] ss:$16 sps:$4 sm:$0xff]   ;;  %v3362_v7 = vld [vmem:[#allocation4 + $0x20] ss:$16 sps:$4 sm:$0xff]   ;;  %v3363_v8 = vld [vmem:[#allocation4 + $0x28] ss:$16 sps:$4 sm:$0xff]  }
  0x2b   :  { %1271 = vmatprep.subr.bf16.mxu0 %v3358_v5  ;;  %1400 = vmatprep.subr.bf16.mxu1 %v3360_v6  ;;  %v3364_v9 = vld [vmem:[#allocation4 + $0x44] ss:$16 sps:$4 sm:$0xff]   ;;  %v3366_v10 = vld [vmem:[#allocation4 + $0x4c] ss:$16 sps:$4 sm:$0xff]   ;;  %v3368_v11 = vld [vmem:[#allocation4 + $0x40] ss:$16 sps:$4 sm:$0xff]  }
  0x2c   :  { %v3369_v12 = vld [vmem:[#allocation4 + $0x48] ss:$16 sps:$4 sm:$0xff]   ;;  %v3370_v13 = vld [vmem:[#allocation4 + $0x64] ss:$16 sps:$4 sm:$0xff]   ;;  %v3372_v14 = vld [vmem:[#allocation4 + $0x6c] ss:$16 sps:$4 sm:$0xff]  }
  0x2d   :  { %v3374_v15 = vld [vmem:[#allocation4 + $0x60] ss:$16 sps:$4 sm:$0xff]   ;;  %v3375_v16 = vld [vmem:[#allocation4 + $0x68] ss:$16 sps:$4 sm:$0xff]   ;;  %v3376_v17 = vld [vmem:[#allocation4 + $0x84] ss:$16 sps:$4 sm:$0xff]  }
  0x2e   :  { %1272 = vmatpush1.bf16.msra.mxu0 %v3362_v7  ;;  %1401 = vmatpush1.bf16.msra.mxu1 %v3363_v8  ;;  %v3378_v18 = vld [vmem:[#allocation4 + $0x8c] ss:$16 sps:$4 sm:$0xff]   ;;  %v3380_v19 = vld [vmem:[#allocation4 + $0x80] ss:$16 sps:$4 sm:$0xff]   ;;  %v3381_v20 = vld [vmem:[#allocation4 + $0x88] ss:$16 sps:$4 sm:$0xff]  }
  0x2f   :  { %1273 = vmatprep.subr.bf16.mxu0 %v3364_v9  ;;  %1402 = vmatprep.subr.bf16.mxu1 %v3366_v10  ;;  %v3382_v21 = vld [vmem:[#allocation4 + $0xa4] ss:$16 sps:$4 sm:$0xff]   ;;  %v3384_v22 = vld [vmem:[#allocation4 + $0xac] ss:$16 sps:$4 sm:$0xff]   ;;  %v3386_v23 = vld [vmem:[#allocation4 + $0xa0] ss:$16 sps:$4 sm:$0xff]  }
  0x30   :  { %v3387_v24 = vld [vmem:[#allocation4 + $0xa8] ss:$16 sps:$4 sm:$0xff]   ;;  %v3388_v25 = vld [vmem:[#allocation4 + $0xc4] ss:$16 sps:$4 sm:$0xff]   ;;  %v3390_v26 = vld [vmem:[#allocation4 + $0xcc] ss:$16 sps:$4 sm:$0xff]  }
  0x31   :  { %v3392_v27 = vld [vmem:[#allocation4 + $0xc0] ss:$16 sps:$4 sm:$0xff]   ;;  %v3393_v28 = vld [vmem:[#allocation4 + $0xc8] ss:$16 sps:$4 sm:$0xff]   ;;  %v3394_v29 = vld [vmem:[#allocation4 + $0xe4] ss:$16 sps:$4 sm:$0xff]  }
  0x32   :  { %1274 = vmatpush1.bf16.msra.mxu0 %v3368_v11  ;;  %1403 = vmatpush1.bf16.msra.mxu1 %v3369_v12  ;;  %v3396_v30 = vld [vmem:[#allocation4 + $0xec] ss:$16 sps:$4 sm:$0xff]   ;;  %v3398_v31 = vld [vmem:[#allocation4 + $0xe0] ss:$16 sps:$4 sm:$0xff]   ;;  %v3399_v32 = vld [vmem:[#allocation4 + $0xe8] ss:$16 sps:$4 sm:$0xff]  }
  0x33   :  { %1275 = vmatprep.subr.bf16.mxu0 %v3370_v13  ;;  %1404 = vmatprep.subr.bf16.mxu1 %v3372_v14  ;;  %v3400_v33 = vld [vmem:[#allocation4 + $0x104] ss:$16 sps:$4 sm:$0xff]   ;;  %v3402_v34 = vld [vmem:[#allocation4 + $0x10c] ss:$16 sps:$4 sm:$0xff]   ;;  %v3404_v35 = vld [vmem:[#allocation4 + $0x100] ss:$16 sps:$4 sm:$0xff]  }
  0x34   :  { %v3405_v36 = vld [vmem:[#allocation4 + $0x108] ss:$16 sps:$4 sm:$0xff]   ;;  %v3406_v37 = vld [vmem:[#allocation4 + $0x124] ss:$16 sps:$4 sm:$0xff]   ;;  %v3408_v38 = vld [vmem:[#allocation4 + $0x12c] ss:$16 sps:$4 sm:$0xff]  }
  0x35   :  { %v3410_v39 = vld [vmem:[#allocation4 + $0x120] ss:$16 sps:$4 sm:$0xff]   ;;  %v3411_v40 = vld [vmem:[#allocation4 + $0x128] ss:$16 sps:$4 sm:$0xff]   ;;  %v3412_v41 = vld [vmem:[#allocation4 + $0x144] ss:$16 sps:$4 sm:$0xff]  }
  0x36   :  { %1276 = vmatpush1.bf16.msra.mxu0 %v3374_v15  ;;  %1405 = vmatpush1.bf16.msra.mxu1 %v3375_v16  ;;  %v3414_v42 = vld [vmem:[#allocation4 + $0x14c] ss:$16 sps:$4 sm:$0xff]   ;;  %v3416_v43 = vld [vmem:[#allocation4 + $0x140] ss:$16 sps:$4 sm:$0xff]   ;;  %v3417_v44 = vld [vmem:[#allocation4 + $0x148] ss:$16 sps:$4 sm:$0xff]  }
  0x37   :  { %1277 = vmatprep.subr.bf16.mxu0 %v3376_v17  ;;  %1406 = vmatprep.subr.bf16.mxu1 %v3378_v18  ;;  %v3418_v45 = vld [vmem:[#allocation4 + $0x164] ss:$16 sps:$4 sm:$0xff]   ;;  %v3420_v46 = vld [vmem:[#allocation4 + $0x16c] ss:$16 sps:$4 sm:$0xff]   ;;  %v3422_v49 = vld [vmem:[#allocation4 + $0x160] ss:$16 sps:$4 sm:$0xff]  }
  0x38   :  { %v65_v47 = vld [vmem:[%s4186_s0 + $0x8] sm:$0xff]  ;;  %v71_v48 = vld [vmem:[%s4186_s0 + $0x38] sm:$0xff]  ;;  %v64_v54 = vld [vmem:[%s4186_s0] sm:$0xff]  ;;  %v3924_v5 = vmov 0   ;;  %vm87_vm0 = vcmask 572416   ;;  %vm2869_vm1 = vcmask 261120  }
  0x39   :  { %v3423_v50 = vld [vmem:[#allocation4 + $0x168] ss:$16 sps:$4 sm:$0xff]   ;;  %v77_v51 = vpack.c.bf16 %v71_v48, %v65_v47  ;;  %v3424_v52 = vld [vmem:[#allocation4 + $0x184] ss:$16 sps:$4 sm:$0xff]   ;;  %v3426_v53 = vld [vmem:[#allocation4 + $0x18c] ss:$16 sps:$4 sm:$0xff]  }
  0x3a   :  { %1278 = vmatpush1.bf16.msra.mxu0 %v3380_v19  ;;  %1407 = vmatpush1.bf16.msra.mxu1 %v3381_v20  ;;  %v70_v55 = vld [vmem:[%s4186_s0 + $0x30] sm:$0xff]  ;;  %v3429_v57 = vld [vmem:[#allocation4 + $0x188] ss:$16 sps:$4 sm:$0xff]   ;;  %63 = vst [vmem:[#allocation2 + $0x28] sm:$0xff] %v3924_v5  ;;  %vm2897_vm2 = vcmask 7168  }
  0x3b   :  { %1279 = vmatprep.subr.bf16.mxu0 %v3382_v21  ;;  %1408 = vmatprep.subr.bf16.mxu1 %v3384_v22  ;;  %v3428_v56 = vld [vmem:[#allocation4 + $0x180] ss:$16 sps:$4 sm:$0xff]   ;;  %v76_v58 = vpack.c.bf16 %v70_v55, %v64_v54  ;;  %v3430_v59 = vld [vmem:[#allocation4 + $0x1a4] ss:$16 sps:$4 sm:$0xff]   ;;  %v3432_v60 = vld [vmem:[#allocation4 + $0x1ac] ss:$16 sps:$4 sm:$0xff]  }
  0x3c   :  { %1301 = vmatprep.mubr.bf16.mxu0 %v77_v51  ;;  %1430 = vmatprep.mubr.bf16.mxu1 %v77_v51  ;;  %v3434_v61 = vld [vmem:[#allocation4 + $0x1a0] ss:$16 sps:$4 sm:$0xff]   ;;  %v3435_v62 = vld [vmem:[#allocation4 + $0x1a8] ss:$16 sps:$4 sm:$0xff]   ;;  %v3436_v63 = vld [vmem:[#allocation4 + $0x1c4] ss:$16 sps:$4 sm:$0xff]  }
  0x3d   :  { %v3438_v0 = vld [vmem:[#allocation4 + $0x1cc] ss:$16 sps:$4 sm:$0xff]   ;;  %v3440_v1 = vld [vmem:[#allocation4 + $0x1c0] ss:$16 sps:$4 sm:$0xff]   ;;  %v3441_v2 = vld [vmem:[#allocation4 + $0x1c8] ss:$16 sps:$4 sm:$0xff]  }
  0x3e   :  { %1280 = vmatpush1.bf16.msra.mxu0 %v3386_v23  ;;  %1409 = vmatpush1.bf16.msra.mxu1 %v3387_v24  ;;  %v3442_v3 = vld [vmem:[#allocation4 + $0x1e4] ss:$16 sps:$4 sm:$0xff]   ;;  %v3444_v4 = vld [vmem:[#allocation4 + $0x1ec] ss:$16 sps:$4 sm:$0xff]   ;;  %v3446_v6 = vld [vmem:[#allocation4 + $0x1e0] ss:$16 sps:$4 sm:$0xff]  }
  0x3f   :  { %1281 = vmatprep.subr.bf16.mxu0 %v3388_v25  ;;  %1410 = vmatprep.subr.bf16.mxu1 %v3390_v26  ;;  %v3447_v7 = vld [vmem:[#allocation4 + $0x1e8] ss:$16 sps:$4 sm:$0xff]   ;;  %v3450_v8 = vld [vmem:[#allocation4 + $0x204] ss:$16 sps:$4 sm:$0xff]   ;;  %v3453_v9 = vld [vmem:[#allocation4 + $0x20c] ss:$16 sps:$4 sm:$0xff]  }
  0x40   :  { %v3448_v10 = vld [vmem:[#allocation4 + $0x200] ss:$16 sps:$4 sm:$0xff]   ;;  %v3451_v11 = vld [vmem:[#allocation4 + $0x208] ss:$16 sps:$4 sm:$0xff]   ;;  %v3456_v12 = vld [vmem:[#allocation4 + $0x224] ss:$16 sps:$4 sm:$0xff]  }
  0x41   :  { %v3459_v13 = vld [vmem:[#allocation4 + $0x22c] ss:$16 sps:$4 sm:$0xff]   ;;  %v3454_v14 = vld [vmem:[#allocation4 + $0x220] ss:$16 sps:$4 sm:$0xff]   ;;  %v3457_v15 = vld [vmem:[#allocation4 + $0x228] ss:$16 sps:$4 sm:$0xff]  }
  0x42   :  { %1282 = vmatpush1.bf16.msra.mxu0 %v3392_v27  ;;  %1411 = vmatpush1.bf16.msra.mxu1 %v3393_v28  ;;  %v3462_v16 = vld [vmem:[#allocation4 + $0x244] ss:$16 sps:$4 sm:$0xff]   ;;  %v3465_v17 = vld [vmem:[#allocation4 + $0x24c] ss:$16 sps:$4 sm:$0xff]   ;;  %v3460_v18 = vld [vmem:[#allocation4 + $0x240] ss:$16 sps:$4 sm:$0xff]  }
  0x43   :  { %1283 = vmatprep.subr.bf16.mxu0 %v3394_v29  ;;  %1412 = vmatprep.subr.bf16.mxu1 %v3396_v30  ;;  %v3463_v19 = vld [vmem:[#allocation4 + $0x248] ss:$16 sps:$4 sm:$0xff]   ;;  %v3468_v20 = vld [vmem:[#allocation4 + $0x264] ss:$16 sps:$4 sm:$0xff]   ;;  %v3471_v21 = vld [vmem:[#allocation4 + $0x26c] ss:$16 sps:$4 sm:$0xff]  }
  0x44   :  { %v3466_v22 = vld [vmem:[#allocation4 + $0x260] ss:$16 sps:$4 sm:$0xff]   ;;  %v3469_v23 = vld [vmem:[#allocation4 + $0x268] ss:$16 sps:$4 sm:$0xff]   ;;  %v3474_v24 = vld [vmem:[#allocation4 + $0x284] ss:$16 sps:$4 sm:$0xff]  }
  0x45   :  { %v3477_v25 = vld [vmem:[#allocation4 + $0x28c] ss:$16 sps:$4 sm:$0xff]   ;;  %v3472_v26 = vld [vmem:[#allocation4 + $0x280] ss:$16 sps:$4 sm:$0xff]   ;;  %v3475_v27 = vld [vmem:[#allocation4 + $0x288] ss:$16 sps:$4 sm:$0xff]  }
  0x46   :  { %1284 = vmatpush1.bf16.msra.mxu0 %v3398_v31  ;;  %1413 = vmatpush1.bf16.msra.mxu1 %v3399_v32  ;;  %v3480_v28 = vld [vmem:[#allocation4 + $0x2a4] ss:$16 sps:$4 sm:$0xff]   ;;  %v3483_v29 = vld [vmem:[#allocation4 + $0x2ac] ss:$16 sps:$4 sm:$0xff]   ;;  %v3478_v30 = vld [vmem:[#allocation4 + $0x2a0] ss:$16 sps:$4 sm:$0xff]  }
  0x47   :  { %1285 = vmatprep.subr.bf16.mxu0 %v3400_v33  ;;  %1414 = vmatprep.subr.bf16.mxu1 %v3402_v34  ;;  %v3481_v31 = vld [vmem:[#allocation4 + $0x2a8] ss:$16 sps:$4 sm:$0xff]   ;;  %v3486_v32 = vld [vmem:[#allocation4 + $0x2c4] ss:$16 sps:$4 sm:$0xff]   ;;  %v3489_v33 = vld [vmem:[#allocation4 + $0x2cc] ss:$16 sps:$4 sm:$0xff]  }
  0x48   :  { %v67_v34 = vld [vmem:[%s4186_s0 + $0x18] sm:$0xff]  ;;  %v3496_v48 = vld [vmem:[#allocation4 + $0x300] ss:$16 sps:$4 sm:$0xff]  }
  0x49   :  { %v3501_v47 = vld [vmem:[#allocation4 + $0x30c] ss:$16 sps:$4 sm:$0xff]   ;;  %v3510_v54 = vld [vmem:[#allocation4 + $0x344] ss:$16 sps:$4 sm:$0xff]   ;;  %v3529_v5 = vld [vmem:[#allocation4 + $0x3a8] ss:$16 sps:$4 sm:$0xff]  }
  0x4a   :  { %1286 = vmatpush1.bf16.msra.mxu0 %v3404_v35  ;;  %1415 = vmatpush1.bf16.msra.mxu1 %v3405_v36  ;;  %v73_v35 = vld [vmem:[%s4186_s0 + $0x48] sm:$0xff]  ;;  %v3484_v36 = vld [vmem:[#allocation4 + $0x2c0] ss:$16 sps:$4 sm:$0xff]  }
  0x4b   :  { %1287 = vmatprep.subr.bf16.mxu0 %v3406_v37  ;;  %1416 = vmatprep.subr.bf16.mxu1 %v3408_v38  ;;  %v3487_v37 = vld [vmem:[#allocation4 + $0x2c8] ss:$16 sps:$4 sm:$0xff]   ;;  %v79_v38 = vpack.c.bf16 %v73_v35, %v67_v34  ;;  %v3507_v51 = vld [vmem:[#allocation4 + $0x32c] ss:$16 sps:$4 sm:$0xff]   ;;  %v3562_v34 = vld [vmem:[#allocation4 + $0x460] ss:$16 sps:$4 sm:$0xff]  }
  0x4c   :  { %v3513_v55 = vld [vmem:[#allocation4 + $0x34c] ss:$16 sps:$4 sm:$0xff]   ;;  %v3565_v35 = vld [vmem:[#allocation4 + $0x468] ss:$16 sps:$4 sm:$0xff]  }
  0x4e   :  { %1288 = vmatpush1.bf16.msra.mxu0 %v3410_v39  ;;  %1417 = vmatpush1.bf16.msra.mxu1 %v3411_v40  ;;  %v3492_v39 = vld [vmem:[#allocation4 + $0x2e4] ss:$16 sps:$4 sm:$0xff]   ;;  %v3495_v40 = vld [vmem:[#allocation4 + $0x2ec] ss:$16 sps:$4 sm:$0xff]  }
  0x4f   :  { %1289 = vmatprep.subr.bf16.mxu0 %v3412_v41  ;;  %1418 = vmatprep.subr.bf16.mxu1 %v3414_v42  ;;  %v66_v41 = vld [vmem:[%s4186_s0 + $0x10] sm:$0xff]  ;;  %v72_v42 = vld [vmem:[%s4186_s0 + $0x40] sm:$0xff] }
  0x52   :  { %1290 = vmatpush1.bf16.msra.mxu0 %v3416_v43  ;;  %1419 = vmatpush1.bf16.msra.mxu1 %v3417_v44  ;;  %v3490_v43 = vld [vmem:[#allocation4 + $0x2e0] ss:$16 sps:$4 sm:$0xff]   ;;  %v3493_v44 = vld [vmem:[#allocation4 + $0x2e8] ss:$16 sps:$4 sm:$0xff]  }
  0x53   :  { %1291 = vmatprep.subr.bf16.mxu0 %v3418_v45  ;;  %1420 = vmatprep.subr.bf16.mxu1 %v3420_v46  ;;  %v4026_v45 = vpack.c.bf16 %v72_v42, %v66_v41  ;;  %v3498_v46 = vld [vmem:[#allocation4 + $0x304] ss:$16 sps:$4 sm:$0xff]   ;;  %v3579_v42 = vld [vmem:[#allocation4 + $0x4ac] ss:$16 sps:$4 sm:$0xff]  }
  0x54   :  { %v3576_v41 = vld [vmem:[#allocation4 + $0x4a4] ss:$16 sps:$4 sm:$0xff]  }
  0x56   :  { %1292 = vmatpush1.bf16.msra.mxu0 %v3422_v49  ;;  %1421 = vmatpush1.bf16.msra.mxu1 %v3423_v50  ;;  %v3499_v49 = vld [vmem:[#allocation4 + $0x308] ss:$16 sps:$4 sm:$0xff]   ;;  %v3504_v50 = vld [vmem:[#allocation4 + $0x324] ss:$16 sps:$4 sm:$0xff]  }
  0x57   :  { %1293 = vmatprep.subr.bf16.mxu0 %v3424_v52  ;;  %1422 = vmatprep.subr.bf16.mxu1 %v3426_v53  ;;  %v3502_v52 = vld [vmem:[#allocation4 + $0x320] ss:$16 sps:$4 sm:$0xff]   ;;  %v3505_v53 = vld [vmem:[#allocation4 + $0x328] ss:$16 sps:$4 sm:$0xff]  }
  0x5a   :  { %1294 = vmatpush1.bf16.msra.mxu0 %v3428_v56  ;;  %1423 = vmatpush1.bf16.msra.mxu1 %v3429_v57  ;;  %v3508_v56 = vld [vmem:[#allocation4 + $0x340] ss:$16 sps:$4 sm:$0xff]   ;;  %v3511_v57 = vld [vmem:[#allocation4 + $0x348] ss:$16 sps:$4 sm:$0xff]  }
  0x5b   :  { %1295 = vmatprep.subr.bf16.mxu0 %v3430_v59  ;;  %1424 = vmatprep.subr.bf16.mxu1 %v3432_v60  ;;  %v3519_v59 = vld [vmem:[#allocation4 + $0x36c] ss:$16 sps:$4 sm:$0xff]   ;;  %v3514_v60 = vld [vmem:[#allocation4 + $0x360] ss:$16 sps:$4 sm:$0xff]  }
  0x5e   :  { %1296 = vmatpush1.bf16.msra.mxu0 %v3434_v61  ;;  %1425 = vmatpush1.bf16.msra.mxu1 %v3435_v62  ;;  %v3517_v61 = vld [vmem:[#allocation4 + $0x368] ss:$16 sps:$4 sm:$0xff]   ;;  %v3522_v62 = vld [vmem:[#allocation4 + $0x384] ss:$16 sps:$4 sm:$0xff]  }
  0x5f   :  { %1297 = vmatprep.subr.bf16.mxu0 %v3436_v63  ;;  %1426 = vmatprep.subr.bf16.mxu1 %v3438_v0  ;;  %v3525_v63 = vld [vmem:[#allocation4 + $0x38c] ss:$16 sps:$4 sm:$0xff]   ;;  %v3520_v0 = vld [vmem:[#allocation4 + $0x380] ss:$16 sps:$4 sm:$0xff]  }
  0x62   :  { %1298 = vmatpush1.bf16.msra.mxu0 %v3440_v1  ;;  %1427 = vmatpush1.bf16.msra.mxu1 %v3441_v2  ;;  %v3523_v1 = vld [vmem:[#allocation4 + $0x388] ss:$16 sps:$4 sm:$0xff]   ;;  %v3528_v2 = vld [vmem:[#allocation4 + $0x3a4] ss:$16 sps:$4 sm:$0xff]  }
  0x63   :  { %1299 = vmatprep.subr.bf16.mxu0 %v3442_v3  ;;  %1428 = vmatprep.subr.bf16.mxu1 %v3444_v4  ;;  %v3531_v3 = vld [vmem:[#allocation4 + $0x3ac] ss:$16 sps:$4 sm:$0xff]   ;;  %v3526_v4 = vld [vmem:[#allocation4 + $0x3a0] ss:$16 sps:$4 sm:$0xff]  }
  0x66   :  { %1300 = vmatpush1.bf16.msra.mxu0 %v3446_v6  ;;  %1429 = vmatpush1.bf16.msra.mxu1 %v3447_v7  ;;  %v3534_v6 = vld [vmem:[#allocation4 + $0x3c4] ss:$16 sps:$4 sm:$0xff]   ;;  %v3537_v7 = vld [vmem:[#allocation4 + $0x3cc] ss:$16 sps:$4 sm:$0xff]  }
  0x67   :  { %1312 = vmatprep.subr.bf16.mxu0 %v3450_v8  ;;  %1441 = vmatprep.subr.bf16.mxu1 %v3453_v9  ;;  %v3532_v8 = vld [vmem:[#allocation4 + $0x3c0] ss:$16 sps:$4 sm:$0xff]   ;;  %v3535_v9 = vld [vmem:[#allocation4 + $0x3c8] ss:$16 sps:$4 sm:$0xff]  }
  0x69   :  { %1302 = vmatmul.mubr.bf16.vlgmr.msra.gmra.mrb[0].mxu0 %v76_v58  ;;  %1431 = vmatmul.mubr.bf16.vlgmr.msra.gmra.mrb[0].mxu1 %v76_v58  ;;  %v3516_v58 = vld [vmem:[#allocation4 + $0x364] ss:$16 sps:$4 sm:$0xff]  }
  0x6a   :  { %1313 = vmatpush1.bf16.msra.mxu0 %v3448_v10  ;;  %1442 = vmatpush1.bf16.msra.mxu1 %v3451_v11  ;;  %v3540_v10 = vld [vmem:[#allocation4 + $0x3e4] ss:$16 sps:$4 sm:$0xff]   ;;  %v3543_v11 = vld [vmem:[#allocation4 + $0x3ec] ss:$16 sps:$4 sm:$0xff]  }
  0x6b   :  { %1314 = vmatprep.subr.bf16.mxu0 %v3456_v12  ;;  %1443 = vmatprep.subr.bf16.mxu1 %v3459_v13  ;;  %v3538_v12 = vld [vmem:[#allocation4 + $0x3e0] ss:$16 sps:$4 sm:$0xff]   ;;  %v3541_v13 = vld [vmem:[#allocation4 + $0x3e8] ss:$16 sps:$4 sm:$0xff]  }
  0x6c   :  { %1344 = vmatprep.mubr.bf16.mxu0 %v79_v38  ;;  %1473 = vmatprep.mubr.bf16.mxu1 %v79_v38 }
  0x6e   :  { %1315 = vmatpush1.bf16.msra.mxu0 %v3454_v14  ;;  %1444 = vmatpush1.bf16.msra.mxu1 %v3457_v15  ;;  %v3546_v14 = vld [vmem:[#allocation4 + $0x404] ss:$16 sps:$4 sm:$0xff]   ;;  %v3549_v15 = vld [vmem:[#allocation4 + $0x40c] ss:$16 sps:$4 sm:$0xff]  }
  0x6f   :  { %1316 = vmatprep.subr.bf16.mxu0 %v3462_v16  ;;  %1445 = vmatprep.subr.bf16.mxu1 %v3465_v17  ;;  %v3544_v16 = vld [vmem:[#allocation4 + $0x400] ss:$16 sps:$4 sm:$0xff]   ;;  %v3547_v17 = vld [vmem:[#allocation4 + $0x408] ss:$16 sps:$4 sm:$0xff]  }
  0x72   :  { %1317 = vmatpush1.bf16.msra.mxu0 %v3460_v18  ;;  %1446 = vmatpush1.bf16.msra.mxu1 %v3463_v19  ;;  %v3552_v18 = vld [vmem:[#allocation4 + $0x424] ss:$16 sps:$4 sm:$0xff]   ;;  %v3555_v19 = vld [vmem:[#allocation4 + $0x42c] ss:$16 sps:$4 sm:$0xff]  }
  0x73   :  { %1318 = vmatprep.subr.bf16.mxu0 %v3468_v20  ;;  %1447 = vmatprep.subr.bf16.mxu1 %v3471_v21  ;;  %v3550_v20 = vld [vmem:[#allocation4 + $0x420] ss:$16 sps:$4 sm:$0xff]   ;;  %v3553_v21 = vld [vmem:[#allocation4 + $0x428] ss:$16 sps:$4 sm:$0xff]  }
  0x76   :  { %1319 = vmatpush1.bf16.msra.mxu0 %v3466_v22  ;;  %1448 = vmatpush1.bf16.msra.mxu1 %v3469_v23  ;;  %v69_v22 = vld [vmem:[%s4186_s0 + $0x28] sm:$0xff]  ;;  %v75_v23 = vld [vmem:[%s4186_s0 + $0x58] sm:$0xff] }
  0x77   :  { %1320 = vmatprep.subr.bf16.mxu0 %v3474_v24  ;;  %1449 = vmatprep.subr.bf16.mxu1 %v3477_v25  ;;  %v68_v24 = vld [vmem:[%s4186_s0 + $0x20] sm:$0xff]  ;;  %v74_v25 = vld [vmem:[%s4186_s0 + $0x50] sm:$0xff] }
  0x7a   :  { %1321 = vmatpush1.bf16.msra.mxu0 %v3472_v26  ;;  %1450 = vmatpush1.bf16.msra.mxu1 %v3475_v27  ;;  %v3558_v26 = vld [vmem:[#allocation4 + $0x444] ss:$16 sps:$4 sm:$0xff]   ;;  %v81_v27 = vpack.c.bf16 %v75_v23, %v69_v22  ;;  %v3645_v22 = vld [vmem:[#allocation6 + $0xc] ss:$16 sps:$4 sm:$0xff]   ;;  %v3640_v23 = vld [vmem:[#allocation6] ss:$16 sps:$4 sm:$0xff]  }
  0x7b   :  { %1322 = vmatprep.subr.bf16.mxu0 %v3480_v28  ;;  %1451 = vmatprep.subr.bf16.mxu1 %v3483_v29  ;;  %v4042_v28 = vpack.c.bf16 %v74_v25, %v68_v24  ;;  %v3561_v29 = vld [vmem:[#allocation4 + $0x44c] ss:$16 sps:$4 sm:$0xff]   ;;  %v3643_v24 = vld [vmem:[#allocation6 + $0x8] ss:$16 sps:$4 sm:$0xff]   ;;  %v3648_v25 = vld [vmem:[#allocation6 + $0x24] ss:$16 sps:$4 sm:$0xff]  }
  0x7c   :  { %88 = vst.msk [vmem:[#allocation2 + $0x28] sm:$0xff] %vm87_vm0, %v81_v27  ;;  %v3646_v27 = vld [vmem:[#allocation6 + $0x20] ss:$16 sps:$4 sm:$0xff]  }
  0x7e   :  { %1323 = vmatpush1.bf16.msra.mxu0 %v3478_v30  ;;  %1452 = vmatpush1.bf16.msra.mxu1 %v3481_v31  ;;  %v3556_v30 = vld [vmem:[#allocation4 + $0x440] ss:$16 sps:$4 sm:$0xff]   ;;  %v3559_v31 = vld [vmem:[#allocation4 + $0x448] ss:$16 sps:$4 sm:$0xff]  }
  0x7f   :  { %1324 = vmatprep.subr.bf16.mxu0 %v3486_v32  ;;  %1453 = vmatprep.subr.bf16.mxu1 %v3489_v33  ;;  %v3564_v32 = vld [vmem:[#allocation4 + $0x464] ss:$16 sps:$4 sm:$0xff]   ;;  %v3567_v33 = vld [vmem:[#allocation4 + $0x46c] ss:$16 sps:$4 sm:$0xff]  }
  0x82   :  { %1325 = vmatpush1.bf16.msra.mxu0 %v3484_v36  ;;  %1454 = vmatpush1.bf16.msra.mxu1 %v3487_v37  ;;  %v3570_v36 = vld [vmem:[#allocation4 + $0x484] ss:$16 sps:$4 sm:$0xff]   ;;  %v3573_v37 = vld [vmem:[#allocation4 + $0x48c] ss:$16 sps:$4 sm:$0xff]  }
  0x83   :  { %1326 = vmatprep.subr.bf16.mxu0 %v3492_v39  ;;  %1455 = vmatprep.subr.bf16.mxu1 %v3495_v40  ;;  %v94_v38 = vld [vmem:[#allocation2 + $0x28] sm:$0xff]  ;;  %v3568_v39 = vld [vmem:[#allocation4 + $0x480] ss:$16 sps:$4 sm:$0xff]  }
  0x84   :  { %v3571_v40 = vld [vmem:[#allocation4 + $0x488] ss:$16 sps:$4 sm:$0xff]  }
  0x86   :  { %1327 = vmatpush1.bf16.msra.mxu0 %v3490_v43  ;;  %1456 = vmatpush1.bf16.msra.mxu1 %v3493_v44  ;;  %v3574_v43 = vld [vmem:[#allocation4 + $0x4a0] ss:$16 sps:$4 sm:$0xff]   ;;  %v3577_v44 = vld [vmem:[#allocation4 + $0x4a8] ss:$16 sps:$4 sm:$0xff]  }
  0x87   :  { %1328 = vmatprep.subr.bf16.mxu0 %v3498_v46  ;;  %1457 = vmatprep.subr.bf16.mxu1 %v3501_v47  ;;  %v3585_v46 = vld [vmem:[#allocation4 + $0x4cc] ss:$16 sps:$4 sm:$0xff]   ;;  %v3580_v47 = vld [vmem:[#allocation4 + $0x4c0] ss:$16 sps:$4 sm:$0xff]  }
  0x8a   :  { %1329 = vmatpush1.bf16.msra.mxu0 %v3496_v48  ;;  %1458 = vmatpush1.bf16.msra.mxu1 %v3499_v49  ;;  %v3583_v48 = vld [vmem:[#allocation4 + $0x4c8] ss:$16 sps:$4 sm:$0xff]   ;;  %v3588_v49 = vld [vmem:[#allocation4 + $0x4e4] ss:$16 sps:$4 sm:$0xff]  }
  0x8b   :  { %1330 = vmatprep.subr.bf16.mxu0 %v3504_v50  ;;  %1459 = vmatprep.subr.bf16.mxu1 %v3507_v51  ;;  %v3591_v50 = vld [vmem:[#allocation4 + $0x4ec] ss:$16 sps:$4 sm:$0xff]   ;;  %v3586_v51 = vld [vmem:[#allocation4 + $0x4e0] ss:$16 sps:$4 sm:$0xff]  }
  0x8e   :  { %1331 = vmatpush1.bf16.msra.mxu0 %v3502_v52  ;;  %1460 = vmatpush1.bf16.msra.mxu1 %v3505_v53  ;;  %v3589_v52 = vld [vmem:[#allocation4 + $0x4e8] ss:$16 sps:$4 sm:$0xff]   ;;  %v3594_v53 = vld [vmem:[#allocation4 + $0x504] ss:$16 sps:$4 sm:$0xff]  }
  0x8f   :  { %1332 = vmatprep.subr.bf16.mxu0 %v3510_v54  ;;  %1461 = vmatprep.subr.bf16.mxu1 %v3513_v55  ;;  %v3597_v54 = vld [vmem:[#allocation4 + $0x50c] ss:$16 sps:$4 sm:$0xff]   ;;  %v3592_v55 = vld [vmem:[#allocation4 + $0x500] ss:$16 sps:$4 sm:$0xff]  }
  0x92   :  { %1333 = vmatpush1.bf16.msra.mxu0 %v3508_v56  ;;  %1462 = vmatpush1.bf16.msra.mxu1 %v3511_v57  ;;  %v3595_v56 = vld [vmem:[#allocation4 + $0x508] ss:$16 sps:$4 sm:$0xff]   ;;  %v3600_v57 = vld [vmem:[#allocation4 + $0x524] ss:$16 sps:$4 sm:$0xff]  }
  0x93   :  { %1334 = vmatprep.subr.bf16.mxu0 %v3516_v58  ;;  %1463 = vmatprep.subr.bf16.mxu1 %v3519_v59  ;;  %v3603_v58 = vld [vmem:[#allocation4 + $0x52c] ss:$16 sps:$4 sm:$0xff]   ;;  %v3598_v59 = vld [vmem:[#allocation4 + $0x520] ss:$16 sps:$4 sm:$0xff]  }
  0x96   :  { %1335 = vmatpush1.bf16.msra.mxu0 %v3514_v60  ;;  %1464 = vmatpush1.bf16.msra.mxu1 %v3517_v61  ;;  %v3601_v60 = vld [vmem:[#allocation4 + $0x528] ss:$16 sps:$4 sm:$0xff]   ;;  %v3606_v61 = vld [vmem:[#allocation4 + $0x544] ss:$16 sps:$4 sm:$0xff]  }
  0x97   :  { %1336 = vmatprep.subr.bf16.mxu0 %v3522_v62  ;;  %1465 = vmatprep.subr.bf16.mxu1 %v3525_v63  ;;  %v3609_v62 = vld [vmem:[#allocation4 + $0x54c] ss:$16 sps:$4 sm:$0xff]   ;;  %v3604_v63 = vld [vmem:[#allocation4 + $0x540] ss:$16 sps:$4 sm:$0xff]  }
  0x9a   :  { %1337 = vmatpush1.bf16.msra.mxu0 %v3520_v0  ;;  %1466 = vmatpush1.bf16.msra.mxu1 %v3523_v1  ;;  %v3607_v0 = vld [vmem:[#allocation4 + $0x548] ss:$16 sps:$4 sm:$0xff]   ;;  %v3612_v1 = vld [vmem:[#allocation4 + $0x564] ss:$16 sps:$4 sm:$0xff]  }
  0x9b   :  { %1338 = vmatprep.subr.bf16.mxu0 %v3528_v2  ;;  %1467 = vmatprep.subr.bf16.mxu1 %v3531_v3  ;;  %v3615_v2 = vld [vmem:[#allocation4 + $0x56c] ss:$16 sps:$4 sm:$0xff]   ;;  %v3610_v3 = vld [vmem:[#allocation4 + $0x560] ss:$16 sps:$4 sm:$0xff]  }
  0x9e   :  { %1339 = vmatpush1.bf16.msra.mxu0 %v3526_v4  ;;  %1468 = vmatpush1.bf16.msra.mxu1 %v3529_v5  ;;  %v3613_v4 = vld [vmem:[#allocation4 + $0x568] ss:$16 sps:$4 sm:$0xff]   ;;  %v3618_v5 = vld [vmem:[#allocation4 + $0x584] ss:$16 sps:$4 sm:$0xff]  }
  0x9f   :  { %1340 = vmatprep.subr.bf16.mxu0 %v3534_v6  ;;  %1469 = vmatprep.subr.bf16.mxu1 %v3537_v7  ;;  %v3621_v6 = vld [vmem:[#allocation4 + $0x58c] ss:$16 sps:$4 sm:$0xff]   ;;  %v3616_v7 = vld [vmem:[#allocation4 + $0x580] ss:$16 sps:$4 sm:$0xff]  }
  0xa2   :  { %1341 = vmatpush1.bf16.msra.mxu0 %v3532_v8  ;;  %1470 = vmatpush1.bf16.msra.mxu1 %v3535_v9  ;;  %v3619_v8 = vld [vmem:[#allocation4 + $0x588] ss:$16 sps:$4 sm:$0xff]   ;;  %v3624_v9 = vld [vmem:[#allocation4 + $0x5a4] ss:$16 sps:$4 sm:$0xff]  }
  0xa3   :  { %1342 = vmatprep.subr.bf16.mxu0 %v3540_v10  ;;  %1471 = vmatprep.subr.bf16.mxu1 %v3543_v11  ;;  %v3627_v10 = vld [vmem:[#allocation4 + $0x5ac] ss:$16 sps:$4 sm:$0xff]   ;;  %v3622_v11 = vld [vmem:[#allocation4 + $0x5a0] ss:$16 sps:$4 sm:$0xff]  }
  0xa6   :  { %1343 = vmatpush1.bf16.msra.mxu0 %v3538_v12  ;;  %1472 = vmatpush1.bf16.msra.mxu1 %v3541_v13  ;;  %v3625_v12 = vld [vmem:[#allocation4 + $0x5a8] ss:$16 sps:$4 sm:$0xff]   ;;  %v3630_v13 = vld [vmem:[#allocation4 + $0x5c4] ss:$16 sps:$4 sm:$0xff]  }
  0xa7   :  { %1355 = vmatprep.subr.bf16.mxu0 %v3546_v14  ;;  %1484 = vmatprep.subr.bf16.mxu1 %v3549_v15  ;;  %v3633_v14 = vld [vmem:[#allocation4 + $0x5cc] ss:$16 sps:$4 sm:$0xff]   ;;  %v3628_v15 = vld [vmem:[#allocation4 + $0x5c0] ss:$16 sps:$4 sm:$0xff]  }
  0xa9   :  { %1345 = vmatmul.mubr.bf16.vlgmr.msra.gmra.mrb[0].mxu0 %v4026_v45  ;;  %1474 = vmatmul.mubr.bf16.vlgmr.msra.gmra.mrb[0].mxu1 %v4026_v45  ;;  %v3582_v45 = vld [vmem:[#allocation4 + $0x4c4] ss:$16 sps:$4 sm:$0xff]  }
  0xaa   :  { %1356 = vmatpush1.bf16.msra.mxu0 %v3544_v16  ;;  %1485 = vmatpush1.bf16.msra.mxu1 %v3547_v17  ;;  %v3631_v16 = vld [vmem:[#allocation4 + $0x5c8] ss:$16 sps:$4 sm:$0xff]   ;;  %v3636_v17 = vld [vmem:[#allocation4 + $0x5e4] ss:$16 sps:$4 sm:$0xff]  }
  0xab   :  { %1357 = vmatprep.subr.bf16.mxu0 %v3552_v18  ;;  %1486 = vmatprep.subr.bf16.mxu1 %v3555_v19  ;;  %v3639_v18 = vld [vmem:[#allocation4 + $0x5ec] ss:$16 sps:$4 sm:$0xff]   ;;  %v3634_v19 = vld [vmem:[#allocation4 + $0x5e0] ss:$16 sps:$4 sm:$0xff]  }
  0xac   :  { %1387 = vmatprep.mubr.bf16.mxu0 %v94_v38  ;;  %1516 = vmatprep.mubr.bf16.mxu1 %v94_v38  ;;  %v3666_v38 = vld [vmem:[#allocation6 + $0x84] ss:$16 sps:$4 sm:$0xff]  }
  0xae   :  { %1358 = vmatpush1.bf16.msra.mxu0 %v3550_v20  ;;  %1487 = vmatpush1.bf16.msra.mxu1 %v3553_v21  ;;  %v3637_v20 = vld [vmem:[#allocation4 + $0x5e8] ss:$16 sps:$4 sm:$0xff]   ;;  %v3642_v21 = vld [vmem:[#allocation6 + $0x4] ss:$16 sps:$4 sm:$0xff]  }
  0xaf   :  { %1359 = vmatprep.subr.bf16.mxu0 %v3558_v26  ;;  %1488 = vmatprep.subr.bf16.mxu1 %v3561_v29  ;;  %v3651_v26 = vld [vmem:[#allocation6 + $0x2c] ss:$16 sps:$4 sm:$0xff]   ;;  %v3649_v29 = vld [vmem:[#allocation6 + $0x28] ss:$16 sps:$4 sm:$0xff]  }
  0xb2   :  { %1360 = vmatpush1.bf16.msra.mxu0 %v3556_v30  ;;  %1489 = vmatpush1.bf16.msra.mxu1 %v3559_v31  ;;  %v3654_v30 = vld [vmem:[#allocation6 + $0x44] ss:$16 sps:$4 sm:$0xff]   ;;  %v3657_v31 = vld [vmem:[#allocation6 + $0x4c] ss:$16 sps:$4 sm:$0xff]  }
  0xb3   :  { %1361 = vmatprep.subr.bf16.mxu0 %v3564_v32  ;;  %1490 = vmatprep.subr.bf16.mxu1 %v3567_v33  ;;  %v3652_v32 = vld [vmem:[#allocation6 + $0x40] ss:$16 sps:$4 sm:$0xff]   ;;  %v3655_v33 = vld [vmem:[#allocation6 + $0x48] ss:$16 sps:$4 sm:$0xff]  }
  0xb6   :  { %1362 = vmatpush1.bf16.msra.mxu0 %v3562_v34  ;;  %1491 = vmatpush1.bf16.msra.mxu1 %v3565_v35  ;;  %v3660_v34 = vld [vmem:[#allocation6 + $0x64] ss:$16 sps:$4 sm:$0xff]   ;;  %v3663_v35 = vld [vmem:[#allocation6 + $0x6c] ss:$16 sps:$4 sm:$0xff]  }
  0xb7   :  { %1363 = vmatprep.subr.bf16.mxu0 %v3570_v36  ;;  %1492 = vmatprep.subr.bf16.mxu1 %v3573_v37  ;;  %v3658_v36 = vld [vmem:[#allocation6 + $0x60] ss:$16 sps:$4 sm:$0xff]   ;;  %v3661_v37 = vld [vmem:[#allocation6 + $0x68] ss:$16 sps:$4 sm:$0xff]  }
  0xba   :  { %1364 = vmatpush1.bf16.msra.mxu0 %v3568_v39  ;;  %1493 = vmatpush1.bf16.msra.mxu1 %v3571_v40  ;;  %v3669_v39 = vld [vmem:[#allocation6 + $0x8c] ss:$16 sps:$4 sm:$0xff]   ;;  %v3667_v40 = vld [vmem:[#allocation6 + $0x88] ss:$16 sps:$4 sm:$0xff]  }
  0xbb   :  { %1365 = vmatprep.subr.bf16.mxu0 %v3576_v41  ;;  %1494 = vmatprep.subr.bf16.mxu1 %v3579_v42  ;;  %v3672_v41 = vld [vmem:[#allocation6 + $0xa4] ss:$16 sps:$4 sm:$0xff]   ;;  %v3675_v42 = vld [vmem:[#allocation6 + $0xac] ss:$16 sps:$4 sm:$0xff]  }
  0xbe   :  { %1366 = vmatpush1.bf16.msra.mxu0 %v3574_v43  ;;  %1495 = vmatpush1.bf16.msra.mxu1 %v3577_v44  ;;  %v3670_v43 = vld [vmem:[#allocation6 + $0xa0] ss:$16 sps:$4 sm:$0xff]   ;;  %v3673_v44 = vld [vmem:[#allocation6 + $0xa8] ss:$16 sps:$4 sm:$0xff]  }
  0xbf   :  { %1367 = vmatprep.subr.bf16.mxu0 %v3582_v45  ;;  %1496 = vmatprep.subr.bf16.mxu1 %v3585_v46  ;;  %v3678_v45 = vld [vmem:[#allocation6 + $0xc4] ss:$16 sps:$4 sm:$0xff]   ;;  %v3681_v46 = vld [vmem:[#allocation6 + $0xcc] ss:$16 sps:$4 sm:$0xff]  }
  0xc2   :  { %1368 = vmatpush1.bf16.msra.mxu0 %v3580_v47  ;;  %1497 = vmatpush1.bf16.msra.mxu1 %v3583_v48  ;;  %v3676_v47 = vld [vmem:[#allocation6 + $0xc0] ss:$16 sps:$4 sm:$0xff]   ;;  %v3679_v48 = vld [vmem:[#allocation6 + $0xc8] ss:$16 sps:$4 sm:$0xff]  }
  0xc3   :  { %1369 = vmatprep.subr.bf16.mxu0 %v3588_v49  ;;  %1498 = vmatprep.subr.bf16.mxu1 %v3591_v50  ;;  %v3684_v49 = vld [vmem:[#allocation6 + $0xe4] ss:$16 sps:$4 sm:$0xff]   ;;  %v3687_v50 = vld [vmem:[#allocation6 + $0xec] ss:$16 sps:$4 sm:$0xff]  }
  0xc6   :  { %1370 = vmatpush1.bf16.msra.mxu0 %v3586_v51  ;;  %1499 = vmatpush1.bf16.msra.mxu1 %v3589_v52  ;;  %v3682_v51 = vld [vmem:[#allocation6 + $0xe0] ss:$16 sps:$4 sm:$0xff]   ;;  %v3685_v52 = vld [vmem:[#allocation6 + $0xe8] ss:$16 sps:$4 sm:$0xff]  }
  0xc7   :  { %1371 = vmatprep.subr.bf16.mxu0 %v3594_v53  ;;  %1500 = vmatprep.subr.bf16.mxu1 %v3597_v54  ;;  %v3690_v53 = vld [vmem:[#allocation6 + $0x104] ss:$16 sps:$4 sm:$0xff]   ;;  %v3693_v54 = vld [vmem:[#allocation6 + $0x10c] ss:$16 sps:$4 sm:$0xff]  }
  0xca   :  { %1372 = vmatpush1.bf16.msra.mxu0 %v3592_v55  ;;  %1501 = vmatpush1.bf16.msra.mxu1 %v3595_v56  ;;  %v3688_v55 = vld [vmem:[#allocation6 + $0x100] ss:$16 sps:$4 sm:$0xff]   ;;  %v3691_v56 = vld [vmem:[#allocation6 + $0x108] ss:$16 sps:$4 sm:$0xff]  }
  0xcb   :  { %1373 = vmatprep.subr.bf16.mxu0 %v3600_v57  ;;  %1502 = vmatprep.subr.bf16.mxu1 %v3603_v58  ;;  %v3696_v57 = vld [vmem:[#allocation6 + $0x124] ss:$16 sps:$4 sm:$0xff]   ;;  %v3699_v58 = vld [vmem:[#allocation6 + $0x12c] ss:$16 sps:$4 sm:$0xff]  }
  0xce   :  { %1374 = vmatpush1.bf16.msra.mxu0 %v3598_v59  ;;  %1503 = vmatpush1.bf16.msra.mxu1 %v3601_v60  ;;  %v3694_v59 = vld [vmem:[#allocation6 + $0x120] ss:$16 sps:$4 sm:$0xff]   ;;  %v3697_v60 = vld [vmem:[#allocation6 + $0x128] ss:$16 sps:$4 sm:$0xff]  }
  0xcf   :  { %1375 = vmatprep.subr.bf16.mxu0 %v3606_v61  ;;  %1504 = vmatprep.subr.bf16.mxu1 %v3609_v62  ;;  %v3702_v61 = vld [vmem:[#allocation6 + $0x144] ss:$16 sps:$4 sm:$0xff]   ;;  %v3705_v62 = vld [vmem:[#allocation6 + $0x14c] ss:$16 sps:$4 sm:$0xff]  }
  0xd2   :  { %1376 = vmatpush1.bf16.msra.mxu0 %v3604_v63  ;;  %1505 = vmatpush1.bf16.msra.mxu1 %v3607_v0  ;;  %v3700_v63 = vld [vmem:[#allocation6 + $0x140] ss:$16 sps:$4 sm:$0xff]   ;;  %v3703_v0 = vld [vmem:[#allocation6 + $0x148] ss:$16 sps:$4 sm:$0xff]  }
  0xd3   :  { %1377 = vmatprep.subr.bf16.mxu0 %v3612_v1  ;;  %1506 = vmatprep.subr.bf16.mxu1 %v3615_v2  ;;  %v3708_v1 = vld [vmem:[#allocation6 + $0x164] ss:$16 sps:$4 sm:$0xff]   ;;  %v3711_v2 = vld [vmem:[#allocation6 + $0x16c] ss:$16 sps:$4 sm:$0xff]  }
  0xd6   :  { %1378 = vmatpush1.bf16.msra.mxu0 %v3610_v3  ;;  %1507 = vmatpush1.bf16.msra.mxu1 %v3613_v4  ;;  %v3706_v3 = vld [vmem:[#allocation6 + $0x160] ss:$16 sps:$4 sm:$0xff]   ;;  %v3709_v4 = vld [vmem:[#allocation6 + $0x168] ss:$16 sps:$4 sm:$0xff]  }
  0xd7   :  { %1379 = vmatprep.subr.bf16.mxu0 %v3618_v5  ;;  %1508 = vmatprep.subr.bf16.mxu1 %v3621_v6  ;;  %v3714_v5 = vld [vmem:[#allocation6 + $0x184] ss:$16 sps:$4 sm:$0xff]   ;;  %v3717_v6 = vld [vmem:[#allocation6 + $0x18c] ss:$16 sps:$4 sm:$0xff]  }
  0xda   :  { %1380 = vmatpush1.bf16.msra.mxu0 %v3616_v7  ;;  %1509 = vmatpush1.bf16.msra.mxu1 %v3619_v8  ;;  %v3712_v7 = vld [vmem:[#allocation6 + $0x180] ss:$16 sps:$4 sm:$0xff]   ;;  %v3715_v8 = vld [vmem:[#allocation6 + $0x188] ss:$16 sps:$4 sm:$0xff]  }
  0xdb   :  { %1381 = vmatprep.subr.bf16.mxu0 %v3624_v9  ;;  %1510 = vmatprep.subr.bf16.mxu1 %v3627_v10  ;;  %v3720_v9 = vld [vmem:[#allocation6 + $0x1a4] ss:$16 sps:$4 sm:$0xff]   ;;  %v3723_v10 = vld [vmem:[#allocation6 + $0x1ac] ss:$16 sps:$4 sm:$0xff]  }
  0xde   :  { %1382 = vmatpush1.bf16.msra.mxu0 %v3622_v11  ;;  %1511 = vmatpush1.bf16.msra.mxu1 %v3625_v12  ;;  %v3718_v11 = vld [vmem:[#allocation6 + $0x1a0] ss:$16 sps:$4 sm:$0xff]   ;;  %v3721_v12 = vld [vmem:[#allocation6 + $0x1a8] ss:$16 sps:$4 sm:$0xff]  }
  0xdf   :  { %1383 = vmatprep.subr.bf16.mxu0 %v3630_v13  ;;  %1512 = vmatprep.subr.bf16.mxu1 %v3633_v14  ;;  %v3726_v13 = vld [vmem:[#allocation6 + $0x1c4] ss:$16 sps:$4 sm:$0xff]   ;;  %v3729_v14 = vld [vmem:[#allocation6 + $0x1cc] ss:$16 sps:$4 sm:$0xff]  }
  0xe2   :  { %1384 = vmatpush1.bf16.msra.mxu0 %v3628_v15  ;;  %1513 = vmatpush1.bf16.msra.mxu1 %v3631_v16  ;;  %v3724_v15 = vld [vmem:[#allocation6 + $0x1c0] ss:$16 sps:$4 sm:$0xff]   ;;  %v3727_v16 = vld [vmem:[#allocation6 + $0x1c8] ss:$16 sps:$4 sm:$0xff]  }
  0xe3   :  { %1385 = vmatprep.subr.bf16.mxu0 %v3636_v17  ;;  %1514 = vmatprep.subr.bf16.mxu1 %v3639_v18  ;;  %v3732_v17 = vld [vmem:[#allocation6 + $0x1e4] ss:$16 sps:$4 sm:$0xff]   ;;  %v3735_v18 = vld [vmem:[#allocation6 + $0x1ec] ss:$16 sps:$4 sm:$0xff]  }
  0xe6   :  { %1386 = vmatpush1.bf16.msra.mxu0 %v3634_v19  ;;  %1515 = vmatpush1.bf16.msra.mxu1 %v3637_v20  ;;  %v3730_v19 = vld [vmem:[#allocation6 + $0x1e0] ss:$16 sps:$4 sm:$0xff]   ;;  %v3733_v20 = vld [vmem:[#allocation6 + $0x1e8] ss:$16 sps:$4 sm:$0xff]  }
  0xe7   :  { %2329 = vmatprep.subr.bf16.mxu0 %v3642_v21  ;;  %2415 = vmatprep.subr.bf16.mxu1 %v3645_v22  ;;  %v3738_v21 = vld [vmem:[#allocation6 + $0x204] ss:$16 sps:$4 sm:$0xff]   ;;  %v3741_v22 = vld [vmem:[#allocation6 + $0x20c] ss:$16 sps:$4 sm:$0xff]  }
  0xe9   :  { %1388 = vmatmul.mubr.bf16.vlgmr.msra.gmra.mrb[0].mxu0 %v4042_v28  ;;  %1517 = vmatmul.mubr.bf16.vlgmr.msra.gmra.mrb[0].mxu1 %v4042_v28  ;;  %v3664_v28 = vld [vmem:[#allocation6 + $0x80] ss:$16 sps:$4 sm:$0xff]  }
  0xea   :  { %2330 = vmatpush1.bf16.msra.mxu0 %v3640_v23  ;;  %2416 = vmatpush1.bf16.msra.mxu1 %v3643_v24  ;;  %v289_v23 = vlaneseq }
  0xeb   :  { %2331 = vmatprep.subr.bf16.mxu0 %v3648_v25  ;;  %2417 = vmatprep.subr.bf16.mxu1 %v3651_v26 }
  0xec   :  { %v4046_v24 = vshrl.u32 %v289_v23, 7  ;;  %v3775_v23 = vld [vmem:[#allocation6 + $0x2c8] ss:$16 sps:$4 sm:$0xff]  }
  0xee   :  { %2332 = vmatpush1.bf16.msra.mxu0 %v3646_v27  ;;  %2418 = vmatpush1.bf16.msra.mxu1 %v3649_v29  ;;  %v291_v25 = vsub.s32 0, %v4046_v24  ;;  %v299_v26 = vsub.s32 2, %v4046_v24  ;;  %v287_v27 = vld [vmem:[%s4188_s2] sm:$0xf]  ;;  %v295_v29 = vsub.s32 1, %v4046_v24 }
  0xef   :  { %2333 = vmatprep.subr.bf16.mxu0 %v3654_v30  ;;  %2419 = vmatprep.subr.bf16.mxu1 %v3657_v31  ;;  %v303_v30 = vsub.s32 3, %v4046_v24 }
  0xf0   :  { %v292_v31 = vrot.slane %v287_v27, %v291_v25 }
  0xf2   :  { %2334 = vmatpush1.bf16.msra.mxu0 %v3652_v32  ;;  %2420 = vmatpush1.bf16.msra.mxu1 %v3655_v33  ;;  %v300_v32 = vrot.slane %v287_v27, %v299_v26  ;;  %v296_v33 = vrot.slane %v287_v27, %v295_v29 }
  0xf3   :  { %2335 = vmatprep.subr.bf16.mxu0 %v3660_v34  ;;  %2421 = vmatprep.subr.bf16.mxu1 %v3663_v35  ;;  %v304_v34 = vrot.slane %v287_v27, %v303_v30  ;;  %v3780_v27 = vld [vmem:[#allocation6 + $0x2e4] ss:$16 sps:$4 sm:$0xff]  }
  0xf6   :  { %2336 = vmatpush1.bf16.msra.mxu0 %v3658_v36  ;;  %2422 = vmatpush1.bf16.msra.mxu1 %v3661_v37 }
  0xf7   :  { %2337 = vmatprep.subr.bf16.mxu0 %v3666_v38  ;;  %2423 = vmatprep.subr.bf16.mxu1 %v3669_v39 }
  0xfa   :  { %2338 = vmatpush1.bf16.msra.mxu0 %v3664_v28  ;;  %2424 = vmatpush1.bf16.msra.mxu1 %v3667_v40 }
  0xfb   :  { %2339 = vmatprep.subr.bf16.mxu0 %v3672_v41  ;;  %2425 = vmatprep.subr.bf16.mxu1 %v3675_v42 }
  0xfe   :  { %2340 = vmatpush1.bf16.msra.mxu0 %v3670_v43  ;;  %2426 = vmatpush1.bf16.msra.mxu1 %v3673_v44 }
  0xff   :  { %2341 = vmatprep.subr.bf16.mxu0 %v3678_v45  ;;  %2427 = vmatprep.subr.bf16.mxu1 %v3681_v46 }
 0x102   :  { %2342 = vmatpush1.bf16.msra.mxu0 %v3676_v47  ;;  %2428 = vmatpush1.bf16.msra.mxu1 %v3679_v48 }
 0x103   :  { %2343 = vmatprep.subr.bf16.mxu0 %v3684_v49  ;;  %2429 = vmatprep.subr.bf16.mxu1 %v3687_v50 }
 0x106   :  { %2344 = vmatpush1.bf16.msra.mxu0 %v3682_v51  ;;  %2430 = vmatpush1.bf16.msra.mxu1 %v3685_v52 }
 0x107   :  { %2345 = vmatprep.subr.bf16.mxu0 %v3690_v53  ;;  %2431 = vmatprep.subr.bf16.mxu1 %v3693_v54 }
 0x10a   :  { %2346 = vmatpush1.bf16.msra.mxu0 %v3688_v55  ;;  %2432 = vmatpush1.bf16.msra.mxu1 %v3691_v56 }
 0x10b   :  { %2347 = vmatprep.subr.bf16.mxu0 %v3696_v57  ;;  %2433 = vmatprep.subr.bf16.mxu1 %v3699_v58 }
 0x10e   :  { %2348 = vmatpush1.bf16.msra.mxu0 %v3694_v59  ;;  %2434 = vmatpush1.bf16.msra.mxu1 %v3697_v60 }
 0x10f   :  { %2349 = vmatprep.subr.bf16.mxu0 %v3702_v61  ;;  %2435 = vmatprep.subr.bf16.mxu1 %v3705_v62  ;;  %v3736_v62 = vld [vmem:[#allocation6 + $0x200] ss:$16 sps:$4 sm:$0xff]  }
 0x112   :  { %2350 = vmatpush1.bf16.msra.mxu0 %v3700_v63  ;;  %2436 = vmatpush1.bf16.msra.mxu1 %v3703_v0  ;;  %v3739_v63 = vld [vmem:[#allocation6 + $0x208] ss:$16 sps:$4 sm:$0xff]   ;;  %v3744_v0 = vld [vmem:[#allocation6 + $0x224] ss:$16 sps:$4 sm:$0xff]  }
 0x113   :  { %2351 = vmatprep.subr.bf16.mxu0 %v3708_v1  ;;  %2437 = vmatprep.subr.bf16.mxu1 %v3711_v2  ;;  %v3747_v1 = vld [vmem:[#allocation6 + $0x22c] ss:$16 sps:$4 sm:$0xff]   ;;  %v3742_v2 = vld [vmem:[#allocation6 + $0x220] ss:$16 sps:$4 sm:$0xff]  }
 0x116   :  { %2352 = vmatpush1.bf16.msra.mxu0 %v3706_v3  ;;  %2438 = vmatpush1.bf16.msra.mxu1 %v3709_v4  ;;  %v3745_v3 = vld [vmem:[#allocation6 + $0x228] ss:$16 sps:$4 sm:$0xff]   ;;  %v3750_v4 = vld [vmem:[#allocation6 + $0x244] ss:$16 sps:$4 sm:$0xff]  }
 0x117   :  { %2353 = vmatprep.subr.bf16.mxu0 %v3714_v5  ;;  %2439 = vmatprep.subr.bf16.mxu1 %v3717_v6  ;;  %v3753_v5 = vld [vmem:[#allocation6 + $0x24c] ss:$16 sps:$4 sm:$0xff]   ;;  %v3748_v6 = vld [vmem:[#allocation6 + $0x240] ss:$16 sps:$4 sm:$0xff]  }
 0x11a   :  { %2354 = vmatpush1.bf16.msra.mxu0 %v3712_v7  ;;  %2440 = vmatpush1.bf16.msra.mxu1 %v3715_v8  ;;  %v3751_v7 = vld [vmem:[#allocation6 + $0x248] ss:$16 sps:$4 sm:$0xff]   ;;  %v3756_v8 = vld [vmem:[#allocation6 + $0x264] ss:$16 sps:$4 sm:$0xff]  }
 0x11b   :  { %2355 = vmatprep.subr.bf16.mxu0 %v3720_v9  ;;  %2441 = vmatprep.subr.bf16.mxu1 %v3723_v10  ;;  %v3759_v9 = vld [vmem:[#allocation6 + $0x26c] ss:$16 sps:$4 sm:$0xff]   ;;  %v3754_v10 = vld [vmem:[#allocation6 + $0x260] ss:$16 sps:$4 sm:$0xff]  }
 0x11e   :  { %2356 = vmatpush1.bf16.msra.mxu0 %v3718_v11  ;;  %2442 = vmatpush1.bf16.msra.mxu1 %v3721_v12  ;;  %v3757_v11 = vld [vmem:[#allocation6 + $0x268] ss:$16 sps:$4 sm:$0xff]   ;;  %v3762_v12 = vld [vmem:[#allocation6 + $0x284] ss:$16 sps:$4 sm:$0xff]  }
 0x11f   :  { %2357 = vmatprep.subr.bf16.mxu0 %v3726_v13  ;;  %2443 = vmatprep.subr.bf16.mxu1 %v3729_v14  ;;  %v3765_v13 = vld [vmem:[#allocation6 + $0x28c] ss:$16 sps:$4 sm:$0xff]   ;;  %v3760_v14 = vld [vmem:[#allocation6 + $0x280] ss:$16 sps:$4 sm:$0xff]  }
 0x122   :  { %2358 = vmatpush1.bf16.msra.mxu0 %v3724_v15  ;;  %2444 = vmatpush1.bf16.msra.mxu1 %v3727_v16  ;;  %v3763_v15 = vld [vmem:[#allocation6 + $0x288] ss:$16 sps:$4 sm:$0xff]   ;;  %v3768_v16 = vld [vmem:[#allocation6 + $0x2a4] ss:$16 sps:$4 sm:$0xff]  }
 0x123   :  { %2359 = vmatprep.subr.bf16.mxu0 %v3732_v17  ;;  %2445 = vmatprep.subr.bf16.mxu1 %v3735_v18  ;;  %v3771_v17 = vld [vmem:[#allocation6 + $0x2ac] ss:$16 sps:$4 sm:$0xff]   ;;  %v3766_v18 = vld [vmem:[#allocation6 + $0x2a0] ss:$16 sps:$4 sm:$0xff]  }
 0x126   :  { %2360 = vmatpush1.bf16.msra.mxu0 %v3730_v19  ;;  %2446 = vmatpush1.bf16.msra.mxu1 %v3733_v20  ;;  %v3769_v19 = vld [vmem:[#allocation6 + $0x2a8] ss:$16 sps:$4 sm:$0xff]   ;;  %v3774_v20 = vld [vmem:[#allocation6 + $0x2c4] ss:$16 sps:$4 sm:$0xff]  }
 0x127   :  { %2372 = vmatprep.subr.bf16.mxu0 %v3738_v21  ;;  %2458 = vmatprep.subr.bf16.mxu1 %v3741_v22  ;;  %v3777_v21 = vld [vmem:[#allocation6 + $0x2cc] ss:$16 sps:$4 sm:$0xff]   ;;  %v3772_v22 = vld [vmem:[#allocation6 + $0x2c0] ss:$16 sps:$4 sm:$0xff]  }
 0x1bc   :  { %v1389_v35 = vpop.f32.mrb[0].mxu0  ;;  %v1518_v36 = vpop.f32.mrb[0].mxu1 }
 0x1bd   :  { %v3307_v37 = vadd.f32 %v1389_v35, %v292_v31  ;;  %v3311_v38 = vadd.f32 %v1518_v36, %v300_v32  ;;  %v1391_v39 = vpop.f32.mrb[1].mxu0  ;;  %v1520_v28 = vpop.f32.mrb[1].mxu1  ;;  %v3789_v35 = vld [vmem:[#allocation6 + $0x30c] ss:$16 sps:$4 sm:$0xff]   ;;  %v3784_v36 = vld [vmem:[#allocation6 + $0x300] ss:$16 sps:$4 sm:$0xff]  }
 0x1be   :  { %v3308_v40 = vadd.f32 %v1391_v39, %v296_v33  ;;  %v3312_v41 = vadd.f32 %v1520_v28, %v304_v34  ;;  %v1393_v42 = vpop.f32.mrb[2].mxu0  ;;  %v1522_v43 = vpop.f32.mrb[2].mxu1  ;;  %v3795_v39 = vld [vmem:[#allocation6 + $0x32c] ss:$16 sps:$4 sm:$0xff]   ;;  %v3790_v28 = vld [vmem:[#allocation6 + $0x320] ss:$16 sps:$4 sm:$0xff]  }
 0x1bf   :  { %v3309_v44 = vadd.f32 %v1393_v42, %v292_v31  ;;  %v3313_v45 = vadd.f32 %v1522_v43, %v300_v32  ;;  %v1395_v46 = vpop.f32.mrb[3].mxu0  ;;  %v1524_v47 = vpop.f32.mrb[3].mxu1  ;;  %v1527_v50 = vmax.f32 %v3307_v37, 0.0  ;;  %v1529_v51 = vmax.f32 %v3311_v38, 0.0  ;;  %v3783_v31 = vld [vmem:[#allocation6 + $0x2ec] ss:$16 sps:$4 sm:$0xff]  }
 0x1c0   :  { %v3310_v48 = vadd.f32 %v1395_v46, %v296_v33  ;;  %v3314_v49 = vadd.f32 %v1524_v47, %v304_v34  ;;  %v1528_v54 = vmax.f32 %v3308_v40, 0.0  ;;  %v1530_v55 = vmax.f32 %v3312_v41, 0.0  ;;  %v3778_v32 = vld [vmem:[#allocation6 + $0x2e0] ss:$16 sps:$4 sm:$0xff]   ;;  %v3781_v33 = vld [vmem:[#allocation6 + $0x2e8] ss:$16 sps:$4 sm:$0xff]  }
 0x1c1   :  { %v1531_v52 = vmax.f32 %v3309_v44, 0.0  ;;  %v1533_v53 = vmax.f32 %v3313_v45, 0.0  ;;  %v3786_v34 = vld [vmem:[#allocation6 + $0x304] ss:$16 sps:$4 sm:$0xff]   ;;  %v3787_v37 = vld [vmem:[#allocation6 + $0x308] ss:$16 sps:$4 sm:$0xff]  }
 0x1c2   :  { %v1532_v56 = vmax.f32 %v3310_v48, 0.0  ;;  %v1534_v57 = vmax.f32 %v3314_v49, 0.0  ;;  %v3792_v38 = vld [vmem:[#allocation6 + $0x324] ss:$16 sps:$4 sm:$0xff]   ;;  %v3793_v40 = vld [vmem:[#allocation6 + $0x328] ss:$16 sps:$4 sm:$0xff]  }
 0x1c3   :  { %v1535_v58 = vpack.c.bf16 %v1531_v52, %v1527_v50  ;;  %v4063_v59 = vpack.c.bf16 %v1533_v53, %v1529_v51  ;;  %v3798_v41 = vld [vmem:[#allocation6 + $0x344] ss:$16 sps:$4 sm:$0xff]   ;;  %v3801_v42 = vld [vmem:[#allocation6 + $0x34c] ss:$16 sps:$4 sm:$0xff]   ;;  %v3796_v43 = vld [vmem:[#allocation6 + $0x340] ss:$16 sps:$4 sm:$0xff]  }
 0x1c4   :  { %v1536_v60 = vpack.c.bf16 %v1532_v56, %v1528_v54  ;;  %v1538_v61 = vpack.c.bf16 %v1534_v57, %v1530_v55  ;;  %v3799_v44 = vld [vmem:[#allocation6 + $0x348] ss:$16 sps:$4 sm:$0xff]   ;;  %v3804_v45 = vld [vmem:[#allocation6 + $0x364] ss:$16 sps:$4 sm:$0xff]   ;;  %v3807_v46 = vld [vmem:[#allocation6 + $0x36c] ss:$16 sps:$4 sm:$0xff]  }
 0x1c5   :  { %v3802_v47 = vld [vmem:[#allocation6 + $0x360] ss:$16 sps:$4 sm:$0xff]   ;;  %v3805_v48 = vld [vmem:[#allocation6 + $0x368] ss:$16 sps:$4 sm:$0xff]   ;;  %v3810_v49 = vld [vmem:[#allocation6 + $0x384] ss:$16 sps:$4 sm:$0xff]  }
 0x1c6   :  { %2361 = vmatprep.mubr.bf16.mxu0 %v1536_v60  ;;  %2447 = vmatprep.mubr.bf16.mxu1 %v1536_v60  ;;  %v3813_v50 = vld [vmem:[#allocation6 + $0x38c] ss:$16 sps:$4 sm:$0xff]   ;;  %v3808_v51 = vld [vmem:[#allocation6 + $0x380] ss:$16 sps:$4 sm:$0xff]   ;;  %v3811_v52 = vld [vmem:[#allocation6 + $0x388] ss:$16 sps:$4 sm:$0xff]  }
 0x1c7   :  { %2362 = vmatmul.mubr.bf16.vlgmr.msra.gmra.mrb[4].mxu0 %v1535_v58  ;;  %2448 = vmatmul.mubr.bf16.vlgmr.msra.gmra.mrb[4].mxu1 %v1535_v58  ;;  %v3816_v53 = vld [vmem:[#allocation6 + $0x3a4] ss:$16 sps:$4 sm:$0xff]   ;;  %v3819_v54 = vld [vmem:[#allocation6 + $0x3ac] ss:$16 sps:$4 sm:$0xff]   ;;  %v3814_v55 = vld [vmem:[#allocation6 + $0x3a0] ss:$16 sps:$4 sm:$0xff]  }
 0x1c8   :  { %2373 = vmatpush1.bf16.msra.mxu0 %v3736_v62  ;;  %2459 = vmatpush1.bf16.msra.mxu1 %v3739_v63  ;;  %v3817_v56 = vld [vmem:[#allocation6 + $0x3a8] ss:$16 sps:$4 sm:$0xff]   ;;  %v3822_v57 = vld [vmem:[#allocation6 + $0x3c4] ss:$16 sps:$4 sm:$0xff]   ;;  %v3825_v58 = vld [vmem:[#allocation6 + $0x3cc] ss:$16 sps:$4 sm:$0xff]  }
 0x1c9   :  { %2404 = vmatprep.mubr.bf16.mxu0 %v1538_v61  ;;  %2490 = vmatprep.mubr.bf16.mxu1 %v1538_v61  ;;  %v3820_v60 = vld [vmem:[#allocation6 + $0x3c0] ss:$16 sps:$4 sm:$0xff]   ;;  %v3823_v61 = vld [vmem:[#allocation6 + $0x3c8] ss:$16 sps:$4 sm:$0xff]   ;;  %v3828_v62 = vld [vmem:[#allocation6 + $0x3e4] ss:$16 sps:$4 sm:$0xff]  }
 0x1ca   :  { %2374 = vmatprep.subr.bf16.mxu0 %v3744_v0  ;;  %2460 = vmatprep.subr.bf16.mxu1 %v3747_v1  ;;  %v3831_v63 = vld [vmem:[#allocation6 + $0x3ec] ss:$16 sps:$4 sm:$0xff]   ;;  %v3826_v0 = vld [vmem:[#allocation6 + $0x3e0] ss:$16 sps:$4 sm:$0xff]   ;;  %v3829_v1 = vld [vmem:[#allocation6 + $0x3e8] ss:$16 sps:$4 sm:$0xff]  }
 0x1cc   :  { %2375 = vmatpush1.bf16.msra.mxu0 %v3742_v2  ;;  %2461 = vmatpush1.bf16.msra.mxu1 %v3745_v3  ;;  %v3832_v2 = vld [vmem:[%s4191_s5 + $0x40] sm:$0xff]  }
 0x1cd   :  { %2376 = vmatprep.subr.bf16.mxu0 %v3750_v4  ;;  %2462 = vmatprep.subr.bf16.mxu1 %v3753_v5  ;;  %v3833_v3 = vld [vmem:[%s4191_s5 + $0xc0] sm:$0xff]  }
 0x1ce   :  { %v3834_v4 = vld [vmem:[%s4191_s5] sm:$0xff]  }
 0x1cf   :  { %v3835_v5 = vld [vmem:[%s4191_s5 + $0x80] sm:$0xff]  }
 0x1d0   :  { %2377 = vmatpush1.bf16.msra.mxu0 %v3748_v6  ;;  %2463 = vmatpush1.bf16.msra.mxu1 %v3751_v7  ;;  %v3836_v6 = vld [vmem:[%s4191_s5 + $0x48] sm:$0xff]  }
 0x1d1   :  { %2378 = vmatprep.subr.bf16.mxu0 %v3756_v8  ;;  %2464 = vmatprep.subr.bf16.mxu1 %v3759_v9  ;;  %v3837_v7 = vld [vmem:[%s4191_s5 + $0xc8] sm:$0xff]  }
 0x1d2   :  { %v3838_v8 = vld [vmem:[%s4191_s5 + $0x8] sm:$0xff]  }
 0x1d3   :  { %v3839_v9 = vld [vmem:[%s4191_s5 + $0x88] sm:$0xff]  }
 0x1d4   :  { %2379 = vmatpush1.bf16.msra.mxu0 %v3754_v10  ;;  %2465 = vmatpush1.bf16.msra.mxu1 %v3757_v11  ;;  %v3840_v10 = vld [vmem:[%s4191_s5 + $0x50] sm:$0xff]  }
 0x1d5   :  { %2380 = vmatprep.subr.bf16.mxu0 %v3762_v12  ;;  %2466 = vmatprep.subr.bf16.mxu1 %v3765_v13  ;;  %v3842_v11 = vld [vmem:[%s4191_s5 + $0x10] sm:$0xff]   ;;  %v3844_v13 = vld [vmem:[%s4191_s5 + $0x58] sm:$0xff]  }
 0x1d6   :  { %v3843_v12 = vld [vmem:[%s4191_s5 + $0x90] sm:$0xff]  }
 0x1d8   :  { %2381 = vmatpush1.bf16.msra.mxu0 %v3760_v14  ;;  %2467 = vmatpush1.bf16.msra.mxu1 %v3763_v15  ;;  %v3845_v14 = vld [vmem:[%s4191_s5 + $0xd8] sm:$0xff]  }
 0x1d9   :  { %2382 = vmatprep.subr.bf16.mxu0 %v3768_v16  ;;  %2468 = vmatprep.subr.bf16.mxu1 %v3771_v17  ;;  %v3846_v15 = vld [vmem:[%s4191_s5 + $0x18] sm:$0xff]   ;;  %v3848_v17 = vld [vmem:[%s4191_s5 + $0x60] sm:$0xff]  }
 0x1da   :  { %v3847_v16 = vld [vmem:[%s4191_s5 + $0x98] sm:$0xff]  }
 0x1dc   :  { %2383 = vmatpush1.bf16.msra.mxu0 %v3766_v18  ;;  %2469 = vmatpush1.bf16.msra.mxu1 %v3769_v19  ;;  %v3849_v18 = vld [vmem:[%s4191_s5 + $0xe0] sm:$0xff]  }
 0x1dd   :  { %2384 = vmatprep.subr.bf16.mxu0 %v3774_v20  ;;  %2470 = vmatprep.subr.bf16.mxu1 %v3777_v21  ;;  %v3850_v19 = vld [vmem:[%s4191_s5 + $0x20] sm:$0xff]   ;;  %v3852_v21 = vld [vmem:[%s4191_s5 + $0x68] sm:$0xff]  }
 0x1de   :  { %v3851_v20 = vld [vmem:[%s4191_s5 + $0xa0] sm:$0xff]  }
 0x1e0   :  { %2385 = vmatpush1.bf16.msra.mxu0 %v3772_v22  ;;  %2471 = vmatpush1.bf16.msra.mxu1 %v3775_v23  ;;  %v3853_v22 = vld [vmem:[%s4191_s5 + $0xe8] sm:$0xff]  }
 0x1e1   :  { %2386 = vmatprep.subr.bf16.mxu0 %v3780_v27  ;;  %2472 = vmatprep.subr.bf16.mxu1 %v3783_v31  ;;  %v3854_v23 = vld [vmem:[%s4191_s5 + $0x28] sm:$0xff]   ;;  %v3856_v31 = vld [vmem:[%s4191_s5 + $0x70] sm:$0xff]  }
 0x1e2   :  { %v3855_v27 = vld [vmem:[%s4191_s5 + $0xa8] sm:$0xff]  }
 0x1e4   :  { %2387 = vmatpush1.bf16.msra.mxu0 %v3778_v32  ;;  %2473 = vmatpush1.bf16.msra.mxu1 %v3781_v33  ;;  %v3857_v32 = vld [vmem:[%s4191_s5 + $0xf0] sm:$0xff]  }
 0x1e5   :  { %2388 = vmatprep.subr.bf16.mxu0 %v3786_v34  ;;  %2474 = vmatprep.subr.bf16.mxu1 %v3789_v35  ;;  %v3858_v33 = vld [vmem:[%s4191_s5 + $0x30] sm:$0xff]   ;;  %v3860_v35 = vld [vmem:[%s4191_s5 + $0x78] sm:$0xff]  }
 0x1e6   :  { %v3859_v34 = vld [vmem:[%s4191_s5 + $0xb0] sm:$0xff]  }
 0x1e8   :  { %2389 = vmatpush1.bf16.msra.mxu0 %v3784_v36  ;;  %2475 = vmatpush1.bf16.msra.mxu1 %v3787_v37  ;;  %v3861_v36 = vld [vmem:[%s4191_s5 + $0xf8] sm:$0xff]  }
 0x1e9   :  { %2390 = vmatprep.subr.bf16.mxu0 %v3792_v38  ;;  %2476 = vmatprep.subr.bf16.mxu1 %v3795_v39  ;;  %v3862_v37 = vld [vmem:[%s4191_s5 + $0x38] sm:$0xff]   ;;  %v1667_v39 = vld [vmem:[%s4190_s4] sm:$0xf] }
 0x1ea   :  { %v3863_v38 = vld [vmem:[%s4191_s5 + $0xb8] sm:$0xff]  }
 0x1ec   :  { %2391 = vmatpush1.bf16.msra.mxu0 %v3790_v28  ;;  %2477 = vmatpush1.bf16.msra.mxu1 %v3793_v40  ;;  %v1672_v28 = vrot.slane %v1667_v39, %v291_v25  ;;  %v1680_v40 = vrot.slane %v1667_v39, %v299_v26 }
 0x1ed   :  { %2392 = vmatprep.subr.bf16.mxu0 %v3798_v41  ;;  %2478 = vmatprep.subr.bf16.mxu1 %v3801_v42  ;;  %v1676_v41 = vrot.slane %v1667_v39, %v295_v29  ;;  %v1684_v42 = vrot.slane %v1667_v39, %v303_v30 }
 0x1f0   :  { %2393 = vmatpush1.bf16.msra.mxu0 %v3796_v43  ;;  %2479 = vmatpush1.bf16.msra.mxu1 %v3799_v44 }
 0x1f1   :  { %2394 = vmatprep.subr.bf16.mxu0 %v3804_v45  ;;  %2480 = vmatprep.subr.bf16.mxu1 %v3807_v46 }
 0x1f4   :  { %2395 = vmatpush1.bf16.msra.mxu0 %v3802_v47  ;;  %2481 = vmatpush1.bf16.msra.mxu1 %v3805_v48 }
 0x1f5   :  { %2396 = vmatprep.subr.bf16.mxu0 %v3810_v49  ;;  %2482 = vmatprep.subr.bf16.mxu1 %v3813_v50 }
 0x1f8   :  { %2397 = vmatpush1.bf16.msra.mxu0 %v3808_v51  ;;  %2483 = vmatpush1.bf16.msra.mxu1 %v3811_v52 }
 0x1f9   :  { %2398 = vmatprep.subr.bf16.mxu0 %v3816_v53  ;;  %2484 = vmatprep.subr.bf16.mxu1 %v3819_v54 }
 0x1fc   :  { %2399 = vmatpush1.bf16.msra.mxu0 %v3814_v55  ;;  %2485 = vmatpush1.bf16.msra.mxu1 %v3817_v56 }
 0x1fd   :  { %2400 = vmatprep.subr.bf16.mxu0 %v3822_v57  ;;  %2486 = vmatprep.subr.bf16.mxu1 %v3825_v58 }
 0x200   :  { %2401 = vmatpush1.bf16.msra.mxu0 %v3820_v60  ;;  %2487 = vmatpush1.bf16.msra.mxu1 %v3823_v61 }
 0x201   :  { %2402 = vmatprep.subr.bf16.mxu0 %v3828_v62  ;;  %2488 = vmatprep.subr.bf16.mxu1 %v3831_v63 }
 0x204   :  { %2403 = vmatpush1.bf16.msra.mxu0 %v3826_v0  ;;  %2489 = vmatpush1.bf16.msra.mxu1 %v3829_v1 }
 0x205   :  { %3263 = vmatprep.subr.bf16.mxu0 %v3832_v2  ;;  %3285 = vmatprep.subr.bf16.mxu1 %v3833_v3 }
 0x207   :  { %2405 = vmatmul.mubr.bf16.vlgmr.msra.gmra.mrb[4].mxu0 %v4063_v59  ;;  %2491 = vmatmul.mubr.bf16.vlgmr.msra.gmra.mrb[4].mxu1 %v4063_v59  ;;  %v3841_v59 = vld [vmem:[%s4191_s5 + $0xd0] sm:$0xff]  }
 0x208   :  { %3264 = vmatpush3.bf16.msra.mxu0 %v3834_v4  ;;  %3286 = vmatpush3.bf16.msra.mxu1 %v3835_v5  ;;  %v3226_v5 = vld [vmem:[%s4192_s6] ss:$0 sm:$0xff] }
 0x209   :  { %3265 = vmatprep.subr.bf16.mxu0 %v3836_v6  ;;  %3287 = vmatprep.subr.bf16.mxu1 %v3837_v7 }
 0x20c   :  { %3266 = vmatpush3.bf16.msra.mxu0 %v3838_v8  ;;  %3288 = vmatpush3.bf16.msra.mxu1 %v3839_v9 }
 0x20d   :  { %3267 = vmatprep.subr.bf16.mxu0 %v3840_v10  ;;  %3289 = vmatprep.subr.bf16.mxu1 %v3841_v59 }
 0x210   :  { %3268 = vmatpush3.bf16.msra.mxu0 %v3842_v11  ;;  %3290 = vmatpush3.bf16.msra.mxu1 %v3843_v12 }
 0x211   :  { %3269 = vmatprep.subr.bf16.mxu0 %v3844_v13  ;;  %3291 = vmatprep.subr.bf16.mxu1 %v3845_v14 }
 0x214   :  { %3270 = vmatpush3.bf16.msra.mxu0 %v3846_v15  ;;  %3292 = vmatpush3.bf16.msra.mxu1 %v3847_v16 }
 0x215   :  { %3271 = vmatprep.subr.bf16.mxu0 %v3848_v17  ;;  %3293 = vmatprep.subr.bf16.mxu1 %v3849_v18  ;;  %v3259_v18 = vld [vmem:[%s4193_s7] ss:$0 sm:$0xff] }
 0x218   :  { %3272 = vmatpush3.bf16.msra.mxu0 %v3850_v19  ;;  %3294 = vmatpush3.bf16.msra.mxu1 %v3851_v20 }
 0x219   :  { %3273 = vmatprep.subr.bf16.mxu0 %v3852_v21  ;;  %3295 = vmatprep.subr.bf16.mxu1 %v3853_v22 }
 0x21c   :  { %3274 = vmatpush3.bf16.msra.mxu0 %v3854_v23  ;;  %3296 = vmatpush3.bf16.msra.mxu1 %v3855_v27 }
 0x21d   :  { %3275 = vmatprep.subr.bf16.mxu0 %v3856_v31  ;;  %3297 = vmatprep.subr.bf16.mxu1 %v3857_v32  ;;  %v3260_v32 = vld [vmem:[#allocation3] ss:$0 sm:$0xff] }
 0x220   :  { %3276 = vmatpush3.bf16.msra.mxu0 %v3858_v33  ;;  %3298 = vmatpush3.bf16.msra.mxu1 %v3859_v34 }
 0x221   :  { %3277 = vmatprep.subr.bf16.mxu0 %v3860_v35  ;;  %3299 = vmatprep.subr.bf16.mxu1 %v3861_v36 }
 0x224   :  { %3278 = vmatpush3.bf16.msra.mxu0 %v3862_v37  ;;  %3300 = vmatpush3.bf16.msra.mxu1 %v3863_v38 }
 0x2da   :  { %v2406_v43 = vpop.f32.mrb[4].mxu0  ;;  %v2492_v44 = vpop.f32.mrb[4].mxu1 }
 0x2db   :  { %v3315_v45 = vadd.f32 %v2406_v43, %v1672_v28  ;;  %v3319_v46 = vadd.f32 %v2492_v44, %v1680_v40  ;;  %v2408_v47 = vpop.f32.mrb[5].mxu0  ;;  %v2494_v48 = vpop.f32.mrb[5].mxu1 }
 0x2dc   :  { %v3316_v49 = vadd.f32 %v2408_v47, %v1676_v41  ;;  %v3320_v50 = vadd.f32 %v2494_v48, %v1684_v42  ;;  %v2410_v51 = vpop.f32.mrb[6].mxu0  ;;  %v2496_v52 = vpop.f32.mrb[6].mxu1 }
 0x2dd   :  { %v3317_v25 = vadd.f32 %v2410_v51, %v1672_v28  ;;  %v3321_v53 = vadd.f32 %v2496_v52, %v1680_v40  ;;  %v2412_v54 = vpop.f32.mrb[7].mxu0  ;;  %v2498_v26 = vpop.f32.mrb[7].mxu1  ;;  %v2501_v29 = vmax.f32 %v3315_v45, 0.0  ;;  %v2503_v57 = vmax.f32 %v3319_v46, 0.0 }
 0x2de   :  { %v3318_v55 = vadd.f32 %v2412_v54, %v1676_v41  ;;  %v3322_v56 = vadd.f32 %v2498_v26, %v1684_v42  ;;  %v2502_v58 = vmax.f32 %v3316_v49, 0.0  ;;  %v2504_v60 = vmax.f32 %v3320_v50, 0.0 }
 0x2df   :  { %v2505_v24 = vmax.f32 %v3317_v25, 0.0  ;;  %v2507_v30 = vmax.f32 %v3321_v53, 0.0 }
 0x2e0   :  { %v2506_v61 = vmax.f32 %v3318_v55, 0.0  ;;  %v2508_v62 = vmax.f32 %v3322_v56, 0.0 }
 0x2e1   :  { %v2509_v63 = vpack.c.bf16 %v2505_v24, %v2501_v29  ;;  %v2511_v0 = vpack.c.bf16 %v2507_v30, %v2503_v57 }
 0x2e2   :  { %v2510_v1 = vpack.c.bf16 %v2506_v61, %v2502_v58  ;;  %v2512_v2 = vpack.c.bf16 %v2508_v62, %v2504_v60 }
 0x2e4   :  { %2808 = vmatprep.mubr.bf16.mxu0 %v2510_v1  ;;  %2849 = vmatprep.mubr.bf16.mxu1 %v2512_v2 }
 0x2e5   :  { %2809 = vmatmul.mubr.bf16.vlgmr.msra.gmra.mrb[8].mxu0 %v2509_v63  ;;  %2850 = vmatmul.mubr.bf16.vlgmr.msra.gmra.mrb[8].mxu1 %v2511_v0 }
 0x3b8   :  { %v3279_v3 = vpop.f32.mrb[8].mxu0  ;;  %v3301_v4 = vpop.f32.mrb[8].mxu1 }
 0x3b9   :  { %v3280_v6 = vpop.f32.mrb[9].mxu0  ;;  %v3302_v7 = vpop.f32.mrb[9].mxu1 }
 0x3ba   :  { %v3281_v8 = vadd.f32 %v3280_v6, %v3279_v3  ;;  %v3303_v9 = vadd.f32 %v3302_v7, %v3301_v4  ;;  %v3282_v10 = vpop.f32.mrb[10].mxu0  ;;  %v3304_v59 = vpop.f32.mrb[10].mxu1 }
 0x3bb   :  { %v3283_v11 = vpop.f32.mrb[11].mxu0  ;;  %v3305_v12 = vpop.f32.mrb[11].mxu1 }
 0x3bc   :  { %v2811_v13 = vadd.f32 %v3281_v8, %v3226_v5  ;;  %v3284_v14 = vadd.f32 %v3283_v11, %v3282_v10  ;;  %v3306_v15 = vadd.f32 %v3305_v12, %v3304_v59 }
 0x3be   :  { %v2852_v16 = vadd.f32 %v3303_v9, %v2811_v13  ;;  %v2814_v17 = vadd.f32 %v3284_v14, %v3226_v5 }
 0x3c0   :  { %v2858_v19 = vmax.f32 %v2852_v16, 0.0  ;;  %v2855_v20 = vadd.f32 %v3306_v15, %v2814_v17 }
 0x3c2   :  { %v2859_v21 = vmax.f32 %v2855_v20, 0.0  ;;  %v2867_v22 = vmul.f32 %v3259_v18, %v2858_v19 }
 0x3c4   :  { %v2870_v23 = vsel %vm2869_vm1, %v2867_v22, 0.0  ;;  %v2868_v27 = vmul.f32 %v3259_v18, %v2859_v21 }
 0x3c5   :  { %2871 = vadd.xlane.f32.xlu0 %v2870_v23 }
 0x3c6   :  { %v2873_v31 = vsel %vm2869_vm1, %v2868_v27, 0.0 }
 0x3c9   :  { %2874 = vadd.xlane.f32.xlu0 %v2873_v31 }
 0x452   :  { %v2872_v33 = vpop.xlane.xlu0 %2871 }
 0x453   :  { %v2883_v34 = vadd.f32 %v3260_v32, %v2872_v33 }
 0x455   :  { %v3261_v35 = vmul.f32 -1.442695, %v2883_v34 }
 0x456   :  { %v2875_v36 = vpop.xlane.xlu0 %2874 }
 0x457   :  { %3864 = vpow2.f32 %v3261_v35  ;;  %v2884_v37 = vadd.f32 %v3260_v32, %v2875_v36 }
 0x459   :  { %v3262_v38 = vmul.f32 -1.442695, %v2884_v37 }
 0x45b   :  { %3866 = vpow2.f32 %v3262_v38 }
 0x461   :  { %v3865_v39 = vpop.eup %3864 }
 0x462   :  { %v2891_v28 = vadd.f32 1.0, %v3865_v39 }
 0x464   :  { %3868 = vrcp.f32 %v2891_v28 }
 0x465   :  { %v3867_v40 = vpop.eup %3866 }
 0x466   :  { %v2892_v41 = vadd.f32 1.0, %v3867_v40 }
 0x468   :  { %3870 = vrcp.f32 %v2892_v41 }
 0x46e   :  { %v3869_v42 = vpop.eup %3868 }
 0x46f   :  { %2898 = vst.msk [vmem:[%s4195_s9] sm:$0xff] %vm2897_vm2, %v3869_v42 }
 0x472   :  { %v3871_v43 = vpop.eup %3870 }
 0x473   :  { %2899 = vst.msk [vmem:[%s4195_s9 + $0x8] sm:$0xff] %vm2897_vm2, %v3871_v43 }
 0x474   :  { %2904 = vsyncpa [#allocation5], 1 }
 0x475   :  { %2905 = vsyncpa [#allocation7], 1 }

</bundles_post_ra>
